<compile_context>
chip_gen: v6e
topology: v6e:2x2x1
jax: 0.10.0
libtpu: 0.0.40
codegen_flags: <defaults>
</compile_context>

<pallas_src>
import functools

import jax
import jax.numpy as jnp
from jax.experimental import pallas as pl
from jax.experimental.pallas import tpu as pltpu


def _plane_layernorm(t, gamma, beta, eps):
    """LayerNorm over the trailing (S, D) plane of t: (Bb, S, D), f32.

    Single-pass statistics: sum and sum-of-squares computed together,
    var = E[t^2] - mean^2 (kept in f32).
    """
    n = float(t.shape[1] * t.shape[2])
    s1 = jnp.sum(jnp.sum(t, axis=2, keepdims=True), axis=1, keepdims=True)
    s2 = jnp.sum(jnp.sum(t * t, axis=2, keepdims=True), axis=1, keepdims=True)
    mu = s1 * (1.0 / n)
    var = s2 * (1.0 / n) - mu * mu
    return (t - mu) * jax.lax.rsqrt(var + eps) * gamma + beta


def _encoder_kernel(
    x_ref,                    # (Bb, S, D)      f32
    wq_ref, bq_ref,           # (H, D, dk) bf16, (H, 1, dk) f32
    wk_ref, bk_ref,           # (H, D, dk) bf16, (H, 1, dk) f32
    wv_ref, bv_ref,           # (H, D, dv) bf16, (H, 1, dv) f32
    wo_ref, bo_ref,           # (H, dv, D) bf16, (1, D)     f32
    w1_ref, b1_ref,           # (D, dff)   bf16, (1, dff)   f32
    w2_ref, b2_ref,           # (dff, D)   bf16, (1, D)     f32
    g1_ref, be1_ref,          # (S, D) f32
    g2_ref, be2_ref,          # (S, D) f32
    out_ref,                  # (Bb, S, D)      f32
    xc_ref,                   # VMEM scratch (Bb, S, D) f32 -- carried activation
    *, num_heads: int, d_k: int, d_v: int, eps: float,
):
    Bb, S, D = x_ref.shape
    H = num_heads
    R = Bb * S
    inv_sqrt_dk = float(d_k) ** -0.5

    layer = pl.program_id(1)

    # First layer for this batch block: load the activation from HBM input.
    @pl.when(layer == 0)
    def _():
        xc_ref[...] = x_ref[...]

    x = xc_ref[...]                      # (Bb, S, D) f32
    x2 = x.reshape(R, D)
    xb = x2.astype(jnp.bfloat16)         # cast once; reused by Q/K/V projections

    # ---- multi-head attention --------------------------------------------
    # Per-head weights are leading-dim indexed (free ref index, no lane
    # slicing); head outputs are folded directly into the output projection.
    acc = None
    for h in range(H):                   # H is small & static; loop unrolled
        qh = (jnp.dot(xb, wq_ref[h], preferred_element_type=jnp.float32)
              + bq_ref[h]) * inv_sqrt_dk                       # (R, dk) f32
        kh = jnp.dot(xb, wk_ref[h], preferred_element_type=jnp.float32) + bk_ref[h]
        vh = jnp.dot(xb, wv_ref[h], preferred_element_type=jnp.float32) + bv_ref[h]

        qh = qh.astype(jnp.bfloat16).reshape(Bb, S, d_k)
        kh = kh.astype(jnp.bfloat16).reshape(Bb, S, d_k)
        vh = vh.astype(jnp.bfloat16).reshape(Bb, S, d_v)

        s = jnp.einsum('bqd,bkd->bqk', qh, kh,
                       preferred_element_type=jnp.float32)     # (Bb, S, S)
        s = s - jnp.max(s, axis=-1, keepdims=True)
        e = jnp.exp(s)
        p = e * pl.reciprocal(jnp.sum(e, axis=-1, keepdims=True), approx=True)

        oh = jnp.einsum('bqk,bkd->bqd', p.astype(jnp.bfloat16), vh,
                        preferred_element_type=jnp.float32)    # (Bb, S, dv)

        contrib = jnp.dot(oh.reshape(R, d_v).astype(jnp.bfloat16), wo_ref[h],
                          preferred_element_type=jnp.float32)  # (R, D)
        acc = contrib if acc is None else acc + contrib
    mha = acc + bo_ref[...]              # (R, D), bias broadcast from (1, D)

    # ---- residual + LayerNorm over (S, D), fused single-pass stats --------
    y = (x2 + mha).reshape(Bb, S, D)     # dropout1 = identity (eval)
    y = _plane_layernorm(y, g1_ref[...], be1_ref[...], eps)

    # ---- position-wise feed-forward ---------------------------------------
    y2 = y.reshape(R, D)
    yb = y2.astype(jnp.bfloat16)
    h1 = jnp.maximum(
        jnp.dot(yb, w1_ref[...], preferred_element_type=jnp.float32) + b1_ref[...],
        0.0)
    ff = jnp.dot(h1.astype(jnp.bfloat16), w2_ref[...],
                 preferred_element_type=jnp.float32) + b2_ref[...]

    # ---- residual + second LayerNorm ---------------------------------------
    z = (y2 + ff).reshape(Bb, S, D)      # dropout2 = identity (eval)
    z = _plane_layernorm(z, g2_ref[...], be2_ref[...], eps)

    xc_ref[...] = z                      # carry to the next layer step

    @pl.when(layer == pl.num_programs(1) - 1)
    def _():
        out_ref[...] = z                 # only the final layer writes to HBM


def _pick_batch_block(B, S, row_cap=1024, min_steps=2):
    """Largest divisor of B with Bb*S <= row_cap, keeping >= min_steps grid
    steps on the batch axis when possible (so v7x's two TensorCores get work)."""
    best = 1
    need_steps = min(min_steps, B)
    for d in range(1, B + 1):
        if B % d:
            continue
        if d * S > row_cap:
            continue
        if B // d < need_steps:
            continue
        best = d
    return best


def encoder_forward(x, params, *, eps=1e-6):
    """Encoder.forward (eval mode). x: (B, S, D) f32. params: stacked (L, ...)."""
    B, S, D = x.shape
    L, H, _, d_k = params["wq"].shape
    d_v = params["wv"].shape[-1]
    dff = params["w1"].shape[-1]

    Bb = _pick_batch_block(B, S)
    nb = B // Bb
    grid = (nb, L)

    def wspec(shape):
        nd = len(shape)
        # Per-layer block: squeeze the leading layer dim; index by layer step.
        return pl.BlockSpec((None,) + shape,
                            lambda b, l, _nd=nd: (l,) + (0,) * _nd)

    in_specs = [
        pl.BlockSpec((Bb, S, D), lambda b, l: (b, 0, 0)),     # x
        wspec((H, D, d_k)), wspec((H, 1, d_k)),               # wq, bq
        wspec((H, D, d_k)), wspec((H, 1, d_k)),               # wk, bk
        wspec((H, D, d_v)), wspec((H, 1, d_v)),               # wv, bv
        wspec((H, d_v, D)), wspec((1, D)),                    # wo, bo
        wspec((D, dff)), wspec((1, dff)),                     # w1, b1
        wspec((dff, D)), wspec((1, D)),                       # w2, b2
        wspec((S, D)), wspec((S, D)),                         # g1, be1
        wspec((S, D)), wspec((S, D)),                         # g2, be2
    ]
    out_spec = pl.BlockSpec((Bb, S, D), lambda b, l: (b, 0, 0))

    # Explicit VMEM limit: weights (double-buffered) + activation tiles +
    # intermediate headroom, clamped to [32 MiB, 64 MiB] (safe on all chips).
    def _sz(shape, itemsize):
        n = 1
        for d in shape:
            n *= d
        return n * itemsize
    wbytes = (2 * _sz((H, D, d_k), 2) + _sz((H, D, d_v), 2) + _sz((H, d_v, D), 2)
              + _sz((D, dff), 2) + _sz((dff, D), 2)
              + 2 * _sz((H, 1, d_k), 4) + _sz((H, 1, d_v), 4)
              + 2 * _sz((1, D), 4) + _sz((1, dff), 4)
              + 4 * _sz((S, D), 4))
    abytes = _sz((Bb, S, D), 4)
    ibytes = Bb * S * max(D, dff, H * max(d_k, d_v)) * 4
    est = 2 * wbytes + 5 * abytes + 8 * ibytes
    vmem_limit = int(min(max(4 * est, 32 * 1024 * 1024), 64 * 1024 * 1024))

    bf16 = jnp.bfloat16
    kernel = functools.partial(_encoder_kernel,
                               num_heads=H, d_k=d_k, d_v=d_v, eps=eps)
    return pl.pallas_call(
        kernel,
        out_shape=jax.ShapeDtypeStruct((B, S, D), jnp.float32),
        grid=grid,
        in_specs=in_specs,
        out_specs=out_spec,
        scratch_shapes=[pltpu.VMEM((Bb, S, D), jnp.float32)],
        compiler_params=pltpu.CompilerParams(
            dimension_semantics=("parallel", "arbitrary"),
            vmem_limit_bytes=vmem_limit),
    )(
        x,
        params["wq"].astype(bf16), params["bq"],
        params["wk"].astype(bf16), params["bk"],
        params["wv"].astype(bf16), params["bv"],
        params["wo"].astype(bf16), params["bo"],
        params["w1"].astype(bf16), params["b1"],
        params["w2"].astype(bf16), params["b2"],
        params["g1"], params["be1"],
        params["g2"], params["be2"],
    )


def init_encoder_params(key, *, num_layers, S, D, H, dk, dv, dff):
    """Deterministic params, per-head layout stacked over layers (leading L)."""
    L = num_layers
    ks = jax.random.split(key, 12)
    scale = 0.05
    return {
        "wq": scale * jax.random.normal(ks[0], (L, H, D, dk), jnp.float32),
        "bq": scale * jax.random.normal(ks[1], (L, H, 1, dk), jnp.float32),
        "wk": scale * jax.random.normal(ks[2], (L, H, D, dk), jnp.float32),
        "bk": scale * jax.random.normal(ks[3], (L, H, 1, dk), jnp.float32),
        "wv": scale * jax.random.normal(ks[4], (L, H, D, dv), jnp.float32),
        "bv": scale * jax.random.normal(ks[5], (L, H, 1, dv), jnp.float32),
        "wo": scale * jax.random.normal(ks[6], (L, H, dv, D), jnp.float32),
        "bo": scale * jax.random.normal(ks[7], (L, 1, D), jnp.float32),
        "w1": scale * jax.random.normal(ks[8], (L, D, dff), jnp.float32),
        "b1": scale * jax.random.normal(ks[9], (L, 1, dff), jnp.float32),
        "w2": scale * jax.random.normal(ks[10], (L, dff, D), jnp.float32),
        "b2": scale * jax.random.normal(ks[11], (L, 1, D), jnp.float32),
        # LayerNorm([S, D]) affine params (PyTorch default init)
        "g1": jnp.ones((L, S, D), jnp.float32),
        "be1": jnp.zeros((L, S, D), jnp.float32),
        "g2": jnp.ones((L, S, D), jnp.float32),
        "be2": jnp.zeros((L, S, D), jnp.float32),
    }


def _reference(x, p, *, eps=1e-6):
    """Pure-JAX f32 reference mirroring the PyTorch Encoder (eval mode)."""
    L, H, D, dk = p["wq"].shape
    dv = p["wv"].shape[-1]
    for l in range(L):
        heads = []
        for h in range(H):
            q = x @ p["wq"][l, h] + p["bq"][l, h, 0]
            k = x @ p["wk"][l, h] + p["bk"][l, h, 0]
            v = x @ p["wv"][l, h] + p["bv"][l, h, 0]
            s = (q @ jnp.swapaxes(k, -1, -2)) / (dk ** 0.5)
            heads.append(jax.nn.softmax(s, axis=-1) @ v)
        mha = (jnp.concatenate(heads, axis=-1) @ p["wo"][l].reshape(H * dv, D)
               + p["bo"][l, 0])
        y = x + mha
        mu = jnp.mean(y, axis=(-2, -1), keepdims=True)
        var = jnp.mean((y - mu) ** 2, axis=(-2, -1), keepdims=True)
        y = (y - mu) / jnp.sqrt(var + eps) * p["g1"][l] + p["be1"][l]
        ff = (jnp.maximum(y @ p["w1"][l] + p["b1"][l, 0], 0.0) @ p["w2"][l]
              + p["b2"][l, 0])
        z = y + ff
        mu2 = jnp.mean(z, axis=(-2, -1), keepdims=True)
        var2 = jnp.mean((z - mu2) ** 2, axis=(-2, -1), keepdims=True)
        x = (z - mu2) / jnp.sqrt(var2 + eps) * p["g2"][l] + p["be2"][l]
    return x


if __name__ == "__main__":
    # Small shapes consistent with the module's structure.
    B, S, D = 2, 8, 32
    H, dk, dv, dff = 4, 8, 8, 64
    num_layers = 2

    key = jax.random.PRNGKey(0)
    kx, kp = jax.random.split(key)
    x = jax.random.normal(kx, (B, S, D), jnp.float32)
    params = init_encoder_params(kp, num_layers=num_layers,
                                 S=S, D=D, H=H, dk=dk, dv=dv, dff=dff)

    out = encoder_forward(x, params)
    out = jax.block_until_ready(out)

    ref = _reference(x, params)
    assert out.shape == (B, S, D)
    # bf16 matmuls + approx reciprocal vs f32 reference -> slightly loose tol.
    max_err = float(jnp.max(jnp.abs(out - ref)))
    assert max_err < 2e-2, f"max abs err {max_err}"

    print("KERNEL_OK")
</pallas_src>

<mosaic_0001>
module attributes {stable_mosaic.version = 11 : i64} {
  func.func @_encoder_kernel(%arg0: i32, %arg1: i32, %arg2: memref<1x8x32xf32, #tpu.memory_space<vmem>>, %arg3: memref<1x4x32x8xbf16, #tpu.memory_space<vmem>>, %arg4: memref<1x4x1x8xf32, #tpu.memory_space<vmem>>, %arg5: memref<1x4x32x8xbf16, #tpu.memory_space<vmem>>, %arg6: memref<1x4x1x8xf32, #tpu.memory_space<vmem>>, %arg7: memref<1x4x32x8xbf16, #tpu.memory_space<vmem>>, %arg8: memref<1x4x1x8xf32, #tpu.memory_space<vmem>>, %arg9: memref<1x4x8x32xbf16, #tpu.memory_space<vmem>>, %arg10: memref<1x1x32xf32, #tpu.memory_space<vmem>>, %arg11: memref<1x32x64xbf16, #tpu.memory_space<vmem>>, %arg12: memref<1x1x64xf32, #tpu.memory_space<vmem>>, %arg13: memref<1x64x32xbf16, #tpu.memory_space<vmem>>, %arg14: memref<1x1x32xf32, #tpu.memory_space<vmem>>, %arg15: memref<1x8x32xf32, #tpu.memory_space<vmem>>, %arg16: memref<1x8x32xf32, #tpu.memory_space<vmem>>, %arg17: memref<1x8x32xf32, #tpu.memory_space<vmem>>, %arg18: memref<1x8x32xf32, #tpu.memory_space<vmem>>, %arg19: memref<1x8x32xf32, #tpu.memory_space<vmem>>, %arg20: memref<1x8x32xf32, #tpu.memory_space<vmem>>) attributes {dimension_semantics = [#tpu.dimension_semantics<parallel>, #tpu.dimension_semantics<arbitrary>], iteration_bounds = array<i64: 2, 2>, scalar_prefetch = 0 : i64, scratch_operands = 1 : i64, tpu.core_type = #tpu.core_type<tc>, window_params = [{transform_indices = @transform_0, window_bounds = array<i64: 1, 8, 32>}, {transform_indices = @transform_1, window_bounds = array<i64: 1, 4, 32, 8>}, {transform_indices = @transform_2, window_bounds = array<i64: 1, 4, 1, 8>}, {transform_indices = @transform_3, window_bounds = array<i64: 1, 4, 32, 8>}, {transform_indices = @transform_4, window_bounds = array<i64: 1, 4, 1, 8>}, {transform_indices = @transform_5, window_bounds = array<i64: 1, 4, 32, 8>}, {transform_indices = @transform_6, window_bounds = array<i64: 1, 4, 1, 8>}, {transform_indices = @transform_7, window_bounds = array<i64: 1, 4, 8, 32>}, {transform_indices = @transform_8, window_bounds = array<i64: 1, 1, 32>}, {transform_indices = @transform_9, window_bounds = array<i64: 1, 32, 64>}, {transform_indices = @transform_10, window_bounds = array<i64: 1, 1, 64>}, {transform_indices = @transform_11, window_bounds = array<i64: 1, 64, 32>}, {transform_indices = @transform_12, window_bounds = array<i64: 1, 1, 32>}, {transform_indices = @transform_13, window_bounds = array<i64: 1, 8, 32>}, {transform_indices = @transform_14, window_bounds = array<i64: 1, 8, 32>}, {transform_indices = @transform_15, window_bounds = array<i64: 1, 8, 32>}, {transform_indices = @transform_16, window_bounds = array<i64: 1, 8, 32>}, {transform_indices = @transform_17, window_bounds = array<i64: 1, 8, 32>}]} {
    %c0_i32 = arith.constant 0 : i32
    %0 = arith.cmpi eq, %arg1, %c0_i32 : i32
    %1 = arith.extui %0 : i1 to i32
    %c0_i32_0 = arith.constant 0 : i32
    %2 = arith.cmpi ne, %1, %c0_i32_0 : i32
    scf.if %2 {
      %c0_195 = arith.constant 0 : index
      %c0_196 = arith.constant 0 : index
      %c0_197 = arith.constant 0 : index
      %288 = vector.load %arg2[%c0_195, %c0_196, %c0_197] : memref<1x8x32xf32, #tpu.memory_space<vmem>>, vector<1x8x32xf32>
      %c0_198 = arith.constant 0 : index
      %c0_199 = arith.constant 0 : index
      %c0_200 = arith.constant 0 : index
      %289 = vector.load %arg20[%c0_198, %c0_199, %c0_200] : memref<1x8x32xf32, #tpu.memory_space<vmem>>, vector<1x8x32xf32>
      tpu.vector_store %arg20[%c0_198, %c0_199, %c0_200], %288 {strides = array<i32>} : memref<1x8x32xf32, #tpu.memory_space<vmem>>, vector<1x8x32xf32>,
    } else {
    }
    %c0 = arith.constant 0 : index
    %c0_1 = arith.constant 0 : index
    %c0_2 = arith.constant 0 : index
    %3 = vector.load %arg20[%c0, %c0_1, %c0_2] : memref<1x8x32xf32, #tpu.memory_space<vmem>>, vector<1x8x32xf32>
    %4 = vector.shape_cast %3 : vector<1x8x32xf32> to vector<8x32xf32>
    %5 = arith.truncf %4 : vector<8x32xf32> to vector<8x32xbf16>
    %c0_3 = arith.constant 0 : index
    %c0_4 = arith.constant 0 : index
    %c0_5 = arith.constant 0 : index
    %c0_6 = arith.constant 0 : index
    %6 = vector.load %arg3[%c0_3, %c0_4, %c0_5, %c0_6] : memref<1x4x32x8xbf16, #tpu.memory_space<vmem>>, vector<1x1x32x8xbf16>
    %7 = vector.shape_cast %6 : vector<1x1x32x8xbf16> to vector<32x8xbf16>
    %cst = arith.constant dense<0.000000e+00> : vector<8x8xf32>
    %8 = tpu.matmul %5, %7, %cst {dimension_numbers = #tpu.dot_dimension_numbers<[1], [0], [0], [1], [0, 0, 1, 1], [], []>} : vector<8x32xbf16>, vector<32x8xbf16>, vector<8x8xf32> -> vector<8x8xf32>
    %c0_7 = arith.constant 0 : index
    %c0_8 = arith.constant 0 : index
    %c0_9 = arith.constant 0 : index
    %c0_10 = arith.constant 0 : index
    %9 = vector.load %arg4[%c0_7, %c0_8, %c0_9, %c0_10] : memref<1x4x1x8xf32, #tpu.memory_space<vmem>>, vector<1x1x1x8xf32>
    %10 = vector.shape_cast %9 : vector<1x1x1x8xf32> to vector<1x8xf32>
    %11 = vector.broadcast %10 : vector<1x8xf32> to vector<8x8xf32>
    %12 = arith.addf %8, %11 : vector<8x8xf32>
    %cst_11 = arith.constant 0.353553385 : f32
    %13 = vector.broadcast %cst_11 : f32 to vector<8x8xf32>
    %14 = arith.mulf %12, %13 : vector<8x8xf32>
    %c0_12 = arith.constant 0 : index
    %c0_13 = arith.constant 0 : index
    %c0_14 = arith.constant 0 : index
    %c0_15 = arith.constant 0 : index
    %15 = vector.load %arg5[%c0_12, %c0_13, %c0_14, %c0_15] : memref<1x4x32x8xbf16, #tpu.memory_space<vmem>>, vector<1x1x32x8xbf16>
    %16 = vector.shape_cast %15 : vector<1x1x32x8xbf16> to vector<32x8xbf16>
    %cst_16 = arith.constant dense<0.000000e+00> : vector<8x8xf32>
    %17 = tpu.matmul %5, %16, %cst_16 {dimension_numbers = #tpu.dot_dimension_numbers<[1], [0], [0], [1], [0, 0, 1, 1], [], []>} : vector<8x32xbf16>, vector<32x8xbf16>, vector<8x8xf32> -> vector<8x8xf32>
    %c0_17 = arith.constant 0 : index
    %c0_18 = arith.constant 0 : index
    %c0_19 = arith.constant 0 : index
    %c0_20 = arith.constant 0 : index
    %18 = vector.load %arg6[%c0_17, %c0_18, %c0_19, %c0_20] : memref<1x4x1x8xf32, #tpu.memory_space<vmem>>, vector<1x1x1x8xf32>
    %19 = vector.shape_cast %18 : vector<1x1x1x8xf32> to vector<1x8xf32>
    %20 = vector.broadcast %19 : vector<1x8xf32> to vector<8x8xf32>
    %21 = arith.addf %17, %20 : vector<8x8xf32>
    %c0_21 = arith.constant 0 : index
    %c0_22 = arith.constant 0 : index
    %c0_23 = arith.constant 0 : index
    %c0_24 = arith.constant 0 : index
    %22 = vector.load %arg7[%c0_21, %c0_22, %c0_23, %c0_24] : memref<1x4x32x8xbf16, #tpu.memory_space<vmem>>, vector<1x1x32x8xbf16>
    %23 = vector.shape_cast %22 : vector<1x1x32x8xbf16> to vector<32x8xbf16>
    %cst_25 = arith.constant dense<0.000000e+00> : vector<8x8xf32>
    %24 = tpu.matmul %5, %23, %cst_25 {dimension_numbers = #tpu.dot_dimension_numbers<[1], [0], [0], [1], [0, 0, 1, 1], [], []>} : vector<8x32xbf16>, vector<32x8xbf16>, vector<8x8xf32> -> vector<8x8xf32>
    %c0_26 = arith.constant 0 : index
    %c0_27 = arith.constant 0 : index
    %c0_28 = arith.constant 0 : index
    %c0_29 = arith.constant 0 : index
    %25 = vector.load %arg8[%c0_26, %c0_27, %c0_28, %c0_29] : memref<1x4x1x8xf32, #tpu.memory_space<vmem>>, vector<1x1x1x8xf32>
    %26 = vector.shape_cast %25 : vector<1x1x1x8xf32> to vector<1x8xf32>
    %27 = vector.broadcast %26 : vector<1x8xf32> to vector<8x8xf32>
    %28 = arith.addf %24, %27 : vector<8x8xf32>
    %29 = arith.truncf %14 : vector<8x8xf32> to vector<8x8xbf16>
    %30 = vector.shape_cast %29 : vector<8x8xbf16> to vector<1x8x8xbf16>
    %31 = arith.truncf %21 : vector<8x8xf32> to vector<8x8xbf16>
    %32 = vector.shape_cast %31 : vector<8x8xbf16> to vector<1x8x8xbf16>
    %33 = arith.truncf %28 : vector<8x8xf32> to vector<8x8xbf16>
    %34 = vector.shape_cast %33 : vector<8x8xbf16> to vector<1x8x8xbf16>
    "tpu.trace_start"() <{level = 10 : i32, message = "bqd,bkd->bqk"}> : () -> ()
    %cst_30 = arith.constant dense<0.000000e+00> : vector<1x8x8xf32>
    %35 = tpu.matmul %30, %32, %cst_30 {dimension_numbers = #tpu.dot_dimension_numbers<[2], [2], [1], [1], [0, 0, 0, 1, 1, 1], [0], [0]>} : vector<1x8x8xbf16>, vector<1x8x8xbf16>, vector<1x8x8xf32> -> vector<1x8x8xf32>
    "tpu.trace_stop"() : () -> ()
    %cst_31 = arith.constant dense<0xFF800000> : vector<1x8xf32>
    %36 = vector.multi_reduction <maximumf>, %35, %cst_31 [2] : vector<1x8x8xf32> to vector<1x8xf32>
    %37 = vector.shape_cast %36 : vector<1x8xf32> to vector<1x8x1xf32>
    %38 = vector.broadcast %37 : vector<1x8x1xf32> to vector<1x8x8xf32>
    %39 = arith.subf %35, %38 : vector<1x8x8xf32>
    %40 = math.exp %39 : vector<1x8x8xf32>
    %cst_32 = arith.constant dense<0.000000e+00> : vector<1x8xf32>
    %41 = vector.multi_reduction <add>, %40, %cst_32 [2] : vector<1x8x8xf32> to vector<1x8xf32>
    %42 = vector.shape_cast %41 : vector<1x8xf32> to vector<1x8x1xf32>
    %43 = tpu.reciprocal %42 {approx = true} : vector<1x8x1xf32> -> vector<1x8x1xf32>
    %44 = vector.broadcast %43 : vector<1x8x1xf32> to vector<1x8x8xf32>
    %45 = arith.mulf %40, %44 : vector<1x8x8xf32>
    %46 = arith.truncf %45 : vector<1x8x8xf32> to vector<1x8x8xbf16>
    "tpu.trace_start"() <{level = 10 : i32, message = "bqk,bkd->bqd"}> : () -> ()
    %cst_33 = arith.constant dense<0.000000e+00> : vector<1x8x8xf32>
    %47 = tpu.matmul %46, %34, %cst_33 {dimension_numbers = #tpu.dot_dimension_numbers<[2], [1], [1], [2], [0, 0, 0, 1, 1, 2], [0], [0]>} : vector<1x8x8xbf16>, vector<1x8x8xbf16>, vector<1x8x8xf32> -> vector<1x8x8xf32>
    "tpu.trace_stop"() : () -> ()
    %48 = vector.shape_cast %47 : vector<1x8x8xf32> to vector<8x8xf32>
    %49 = arith.truncf %48 : vector<8x8xf32> to vector<8x8xbf16>
    %c0_34 = arith.constant 0 : index
    %c0_35 = arith.constant 0 : index
    %c0_36 = arith.constant 0 : index
    %c0_37 = arith.constant 0 : index
    %50 = vector.load %arg9[%c0_34, %c0_35, %c0_36, %c0_37] : memref<1x4x8x32xbf16, #tpu.memory_space<vmem>>, vector<1x1x8x32xbf16>
    %51 = vector.shape_cast %50 : vector<1x1x8x32xbf16> to vector<8x32xbf16>
    %cst_38 = arith.constant dense<0.000000e+00> : vector<8x32xf32>
    %52 = tpu.matmul %49, %51, %cst_38 {dimension_numbers = #tpu.dot_dimension_numbers<[1], [0], [0], [1], [0, 0, 1, 1], [], []>} : vector<8x8xbf16>, vector<8x32xbf16>, vector<8x32xf32> -> vector<8x32xf32>
    %c0_39 = arith.constant 0 : index
    %c1 = arith.constant 1 : index
    %c0_40 = arith.constant 0 : index
    %c0_41 = arith.constant 0 : index
    %53 = vector.load %arg3[%c0_39, %c1, %c0_40, %c0_41] : memref<1x4x32x8xbf16, #tpu.memory_space<vmem>>, vector<1x1x32x8xbf16>
    %54 = vector.shape_cast %53 : vector<1x1x32x8xbf16> to vector<32x8xbf16>
    %cst_42 = arith.constant dense<0.000000e+00> : vector<8x8xf32>
    %55 = tpu.matmul %5, %54, %cst_42 {dimension_numbers = #tpu.dot_dimension_numbers<[1], [0], [0], [1], [0, 0, 1, 1], [], []>} : vector<8x32xbf16>, vector<32x8xbf16>, vector<8x8xf32> -> vector<8x8xf32>
    %c0_43 = arith.constant 0 : index
    %c1_44 = arith.constant 1 : index
    %c0_45 = arith.constant 0 : index
    %c0_46 = arith.constant 0 : index
    %56 = vector.load %arg4[%c0_43, %c1_44, %c0_45, %c0_46] : memref<1x4x1x8xf32, #tpu.memory_space<vmem>>, vector<1x1x1x8xf32>
    %57 = vector.shape_cast %56 : vector<1x1x1x8xf32> to vector<1x8xf32>
    %58 = vector.broadcast %57 : vector<1x8xf32> to vector<8x8xf32>
    %59 = arith.addf %55, %58 : vector<8x8xf32>
    %cst_47 = arith.constant 0.353553385 : f32
    %60 = vector.broadcast %cst_47 : f32 to vector<8x8xf32>
    %61 = arith.mulf %59, %60 : vector<8x8xf32>
    %c0_48 = arith.constant 0 : index
    %c1_49 = arith.constant 1 : index
    %c0_50 = arith.constant 0 : index
    %c0_51 = arith.constant 0 : index
    %62 = vector.load %arg5[%c0_48, %c1_49, %c0_50, %c0_51] : memref<1x4x32x8xbf16, #tpu.memory_space<vmem>>, vector<1x1x32x8xbf16>
    %63 = vector.shape_cast %62 : vector<1x1x32x8xbf16> to vector<32x8xbf16>
    %cst_52 = arith.constant dense<0.000000e+00> : vector<8x8xf32>
    %64 = tpu.matmul %5, %63, %cst_52 {dimension_numbers = #tpu.dot_dimension_numbers<[1], [0], [0], [1], [0, 0, 1, 1], [], []>} : vector<8x32xbf16>, vector<32x8xbf16>, vector<8x8xf32> -> vector<8x8xf32>
    %c0_53 = arith.constant 0 : index
    %c1_54 = arith.constant 1 : index
    %c0_55 = arith.constant 0 : index
    %c0_56 = arith.constant 0 : index
    %65 = vector.load %arg6[%c0_53, %c1_54, %c0_55, %c0_56] : memref<1x4x1x8xf32, #tpu.memory_space<vmem>>, vector<1x1x1x8xf32>
    %66 = vector.shape_cast %65 : vector<1x1x1x8xf32> to vector<1x8xf32>
    %67 = vector.broadcast %66 : vector<1x8xf32> to vector<8x8xf32>
    %68 = arith.addf %64, %67 : vector<8x8xf32>
    %c0_57 = arith.constant 0 : index
    %c1_58 = arith.constant 1 : index
    %c0_59 = arith.constant 0 : index
    %c0_60 = arith.constant 0 : index
    %69 = vector.load %arg7[%c0_57, %c1_58, %c0_59, %c0_60] : memref<1x4x32x8xbf16, #tpu.memory_space<vmem>>, vector<1x1x32x8xbf16>
    %70 = vector.shape_cast %69 : vector<1x1x32x8xbf16> to vector<32x8xbf16>
    %cst_61 = arith.constant dense<0.000000e+00> : vector<8x8xf32>
    %71 = tpu.matmul %5, %70, %cst_61 {dimension_numbers = #tpu.dot_dimension_numbers<[1], [0], [0], [1], [0, 0, 1, 1], [], []>} : vector<8x32xbf16>, vector<32x8xbf16>, vector<8x8xf32> -> vector<8x8xf32>
    %c0_62 = arith.constant 0 : index
    %c1_63 = arith.constant 1 : index
    %c0_64 = arith.constant 0 : index
    %c0_65 = arith.constant 0 : index
    %72 = vector.load %arg8[%c0_62, %c1_63, %c0_64, %c0_65] : memref<1x4x1x8xf32, #tpu.memory_space<vmem>>, vector<1x1x1x8xf32>
    %73 = vector.shape_cast %72 : vector<1x1x1x8xf32> to vector<1x8xf32>
    %74 = vector.broadcast %73 : vector<1x8xf32> to vector<8x8xf32>
    %75 = arith.addf %71, %74 : vector<8x8xf32>
    %76 = arith.truncf %61 : vector<8x8xf32> to vector<8x8xbf16>
    %77 = vector.shape_cast %76 : vector<8x8xbf16> to vector<1x8x8xbf16>
    %78 = arith.truncf %68 : vector<8x8xf32> to vector<8x8xbf16>
    %79 = vector.shape_cast %78 : vector<8x8xbf16> to vector<1x8x8xbf16>
    %80 = arith.truncf %75 : vector<8x8xf32> to vector<8x8xbf16>
    %81 = vector.shape_cast %80 : vector<8x8xbf16> to vector<1x8x8xbf16>
    "tpu.trace_start"() <{level = 10 : i32, message = "bqd,bkd->bqk"}> : () -> ()
    %cst_66 = arith.constant dense<0.000000e+00> : vector<1x8x8xf32>
    %82 = tpu.matmul %77, %79, %cst_66 {dimension_numbers = #tpu.dot_dimension_numbers<[2], [2], [1], [1], [0, 0, 0, 1, 1, 1], [0], [0]>} : vector<1x8x8xbf16>, vector<1x8x8xbf16>, vector<1x8x8xf32> -> vector<1x8x8xf32>
    "tpu.trace_stop"() : () -> ()
    %cst_67 = arith.constant dense<0xFF800000> : vector<1x8xf32>
    %83 = vector.multi_reduction <maximumf>, %82, %cst_67 [2] : vector<1x8x8xf32> to vector<1x8xf32>
    %84 = vector.shape_cast %83 : vector<1x8xf32> to vector<1x8x1xf32>
    %85 = vector.broadcast %84 : vector<1x8x1xf32> to vector<1x8x8xf32>
    %86 = arith.subf %82, %85 : vector<1x8x8xf32>
    %87 = math.exp %86 : vector<1x8x8xf32>
    %cst_68 = arith.constant dense<0.000000e+00> : vector<1x8xf32>
    %88 = vector.multi_reduction <add>, %87, %cst_68 [2] : vector<1x8x8xf32> to vector<1x8xf32>
    %89 = vector.shape_cast %88 : vector<1x8xf32> to vector<1x8x1xf32>
    %90 = tpu.reciprocal %89 {approx = true} : vector<1x8x1xf32> -> vector<1x8x1xf32>
    %91 = vector.broadcast %90 : vector<1x8x1xf32> to vector<1x8x8xf32>
    %92 = arith.mulf %87, %91 : vector<1x8x8xf32>
    %93 = arith.truncf %92 : vector<1x8x8xf32> to vector<1x8x8xbf16>
    "tpu.trace_start"() <{level = 10 : i32, message = "bqk,bkd->bqd"}> : () -> ()
    %cst_69 = arith.constant dense<0.000000e+00> : vector<1x8x8xf32>
    %94 = tpu.matmul %93, %81, %cst_69 {dimension_numbers = #tpu.dot_dimension_numbers<[2], [1], [1], [2], [0, 0, 0, 1, 1, 2], [0], [0]>} : vector<1x8x8xbf16>, vector<1x8x8xbf16>, vector<1x8x8xf32> -> vector<1x8x8xf32>
    "tpu.trace_stop"() : () -> ()
    %95 = vector.shape_cast %94 : vector<1x8x8xf32> to vector<8x8xf32>
    %96 = arith.truncf %95 : vector<8x8xf32> to vector<8x8xbf16>
    %c0_70 = arith.constant 0 : index
    %c1_71 = arith.constant 1 : index
    %c0_72 = arith.constant 0 : index
    %c0_73 = arith.constant 0 : index
    %97 = vector.load %arg9[%c0_70, %c1_71, %c0_72, %c0_73] : memref<1x4x8x32xbf16, #tpu.memory_space<vmem>>, vector<1x1x8x32xbf16>
    %98 = vector.shape_cast %97 : vector<1x1x8x32xbf16> to vector<8x32xbf16>
    %cst_74 = arith.constant dense<0.000000e+00> : vector<8x32xf32>
    %99 = tpu.matmul %96, %98, %cst_74 {dimension_numbers = #tpu.dot_dimension_numbers<[1], [0], [0], [1], [0, 0, 1, 1], [], []>} : vector<8x8xbf16>, vector<8x32xbf16>, vector<8x32xf32> -> vector<8x32xf32>
    %100 = arith.addf %52, %99 : vector<8x32xf32>
    %c0_75 = arith.constant 0 : index
    %c2 = arith.constant 2 : index
    %c0_76 = arith.constant 0 : index
    %c0_77 = arith.constant 0 : index
    %101 = vector.load %arg3[%c0_75, %c2, %c0_76, %c0_77] : memref<1x4x32x8xbf16, #tpu.memory_space<vmem>>, vector<1x1x32x8xbf16>
    %102 = vector.shape_cast %101 : vector<1x1x32x8xbf16> to vector<32x8xbf16>
    %cst_78 = arith.constant dense<0.000000e+00> : vector<8x8xf32>
    %103 = tpu.matmul %5, %102, %cst_78 {dimension_numbers = #tpu.dot_dimension_numbers<[1], [0], [0], [1], [0, 0, 1, 1], [], []>} : vector<8x32xbf16>, vector<32x8xbf16>, vector<8x8xf32> -> vector<8x8xf32>
    %c0_79 = arith.constant 0 : index
    %c2_80 = arith.constant 2 : index
    %c0_81 = arith.constant 0 : index
    %c0_82 = arith.constant 0 : index
    %104 = vector.load %arg4[%c0_79, %c2_80, %c0_81, %c0_82] : memref<1x4x1x8xf32, #tpu.memory_space<vmem>>, vector<1x1x1x8xf32>
    %105 = vector.shape_cast %104 : vector<1x1x1x8xf32> to vector<1x8xf32>
    %106 = vector.broadcast %105 : vector<1x8xf32> to vector<8x8xf32>
    %107 = arith.addf %103, %106 : vector<8x8xf32>
    %cst_83 = arith.constant 0.353553385 : f32
    %108 = vector.broadcast %cst_83 : f32 to vector<8x8xf32>
    %109 = arith.mulf %107, %108 : vector<8x8xf32>
    %c0_84 = arith.constant 0 : index
    %c2_85 = arith.constant 2 : index
    %c0_86 = arith.constant 0 : index
    %c0_87 = arith.constant 0 : index
    %110 = vector.load %arg5[%c0_84, %c2_85, %c0_86, %c0_87] : memref<1x4x32x8xbf16, #tpu.memory_space<vmem>>, vector<1x1x32x8xbf16>
    %111 = vector.shape_cast %110 : vector<1x1x32x8xbf16> to vector<32x8xbf16>
    %cst_88 = arith.constant dense<0.000000e+00> : vector<8x8xf32>
    %112 = tpu.matmul %5, %111, %cst_88 {dimension_numbers = #tpu.dot_dimension_numbers<[1], [0], [0], [1], [0, 0, 1, 1], [], []>} : vector<8x32xbf16>, vector<32x8xbf16>, vector<8x8xf32> -> vector<8x8xf32>
    %c0_89 = arith.constant 0 : index
    %c2_90 = arith.constant 2 : index
    %c0_91 = arith.constant 0 : index
    %c0_92 = arith.constant 0 : index
    %113 = vector.load %arg6[%c0_89, %c2_90, %c0_91, %c0_92] : memref<1x4x1x8xf32, #tpu.memory_space<vmem>>, vector<1x1x1x8xf32>
    %114 = vector.shape_cast %113 : vector<1x1x1x8xf32> to vector<1x8xf32>
    %115 = vector.broadcast %114 : vector<1x8xf32> to vector<8x8xf32>
    %116 = arith.addf %112, %115 : vector<8x8xf32>
    %c0_93 = arith.constant 0 : index
    %c2_94 = arith.constant 2 : index
    %c0_95 = arith.constant 0 : index
    %c0_96 = arith.constant 0 : index
    %117 = vector.load %arg7[%c0_93, %c2_94, %c0_95, %c0_96] : memref<1x4x32x8xbf16, #tpu.memory_space<vmem>>, vector<1x1x32x8xbf16>
    %118 = vector.shape_cast %117 : vector<1x1x32x8xbf16> to vector<32x8xbf16>
    %cst_97 = arith.constant dense<0.000000e+00> : vector<8x8xf32>
    %119 = tpu.matmul %5, %118, %cst_97 {dimension_numbers = #tpu.dot_dimension_numbers<[1], [0], [0], [1], [0, 0, 1, 1], [], []>} : vector<8x32xbf16>, vector<32x8xbf16>, vector<8x8xf32> -> vector<8x8xf32>
    %c0_98 = arith.constant 0 : index
    %c2_99 = arith.constant 2 : index
    %c0_100 = arith.constant 0 : index
    %c0_101 = arith.constant 0 : index
    %120 = vector.load %arg8[%c0_98, %c2_99, %c0_100, %c0_101] : memref<1x4x1x8xf32, #tpu.memory_space<vmem>>, vector<1x1x1x8xf32>
    %121 = vector.shape_cast %120 : vector<1x1x1x8xf32> to vector<1x8xf32>
    %122 = vector.broadcast %121 : vector<1x8xf32> to vector<8x8xf32>
    %123 = arith.addf %119, %122 : vector<8x8xf32>
    %124 = arith.truncf %109 : vector<8x8xf32> to vector<8x8xbf16>
    %125 = vector.shape_cast %124 : vector<8x8xbf16> to vector<1x8x8xbf16>
    %126 = arith.truncf %116 : vector<8x8xf32> to vector<8x8xbf16>
    %127 = vector.shape_cast %126 : vector<8x8xbf16> to vector<1x8x8xbf16>
    %128 = arith.truncf %123 : vector<8x8xf32> to vector<8x8xbf16>
    %129 = vector.shape_cast %128 : vector<8x8xbf16> to vector<1x8x8xbf16>
    "tpu.trace_start"() <{level = 10 : i32, message = "bqd,bkd->bqk"}> : () -> ()
    %cst_102 = arith.constant dense<0.000000e+00> : vector<1x8x8xf32>
    %130 = tpu.matmul %125, %127, %cst_102 {dimension_numbers = #tpu.dot_dimension_numbers<[2], [2], [1], [1], [0, 0, 0, 1, 1, 1], [0], [0]>} : vector<1x8x8xbf16>, vector<1x8x8xbf16>, vector<1x8x8xf32> -> vector<1x8x8xf32>
    "tpu.trace_stop"() : () -> ()
    %cst_103 = arith.constant dense<0xFF800000> : vector<1x8xf32>
    %131 = vector.multi_reduction <maximumf>, %130, %cst_103 [2] : vector<1x8x8xf32> to vector<1x8xf32>
    %132 = vector.shape_cast %131 : vector<1x8xf32> to vector<1x8x1xf32>
    %133 = vector.broadcast %132 : vector<1x8x1xf32> to vector<1x8x8xf32>
    %134 = arith.subf %130, %133 : vector<1x8x8xf32>
    %135 = math.exp %134 : vector<1x8x8xf32>
    %cst_104 = arith.constant dense<0.000000e+00> : vector<1x8xf32>
    %136 = vector.multi_reduction <add>, %135, %cst_104 [2] : vector<1x8x8xf32> to vector<1x8xf32>
    %137 = vector.shape_cast %136 : vector<1x8xf32> to vector<1x8x1xf32>
    %138 = tpu.reciprocal %137 {approx = true} : vector<1x8x1xf32> -> vector<1x8x1xf32>
    %139 = vector.broadcast %138 : vector<1x8x1xf32> to vector<1x8x8xf32>
    %140 = arith.mulf %135, %139 : vector<1x8x8xf32>
    %141 = arith.truncf %140 : vector<1x8x8xf32> to vector<1x8x8xbf16>
    "tpu.trace_start"() <{level = 10 : i32, message = "bqk,bkd->bqd"}> : () -> ()
    %cst_105 = arith.constant dense<0.000000e+00> : vector<1x8x8xf32>
    %142 = tpu.matmul %141, %129, %cst_105 {dimension_numbers = #tpu.dot_dimension_numbers<[2], [1], [1], [2], [0, 0, 0, 1, 1, 2], [0], [0]>} : vector<1x8x8xbf16>, vector<1x8x8xbf16>, vector<1x8x8xf32> -> vector<1x8x8xf32>
    "tpu.trace_stop"() : () -> ()
    %143 = vector.shape_cast %142 : vector<1x8x8xf32> to vector<8x8xf32>
    %144 = arith.truncf %143 : vector<8x8xf32> to vector<8x8xbf16>
    %c0_106 = arith.constant 0 : index
    %c2_107 = arith.constant 2 : index
    %c0_108 = arith.constant 0 : index
    %c0_109 = arith.constant 0 : index
    %145 = vector.load %arg9[%c0_106, %c2_107, %c0_108, %c0_109] : memref<1x4x8x32xbf16, #tpu.memory_space<vmem>>, vector<1x1x8x32xbf16>
    %146 = vector.shape_cast %145 : vector<1x1x8x32xbf16> to vector<8x32xbf16>
    %cst_110 = arith.constant dense<0.000000e+00> : vector<8x32xf32>
    %147 = tpu.matmul %144, %146, %cst_110 {dimension_numbers = #tpu.dot_dimension_numbers<[1], [0], [0], [1], [0, 0, 1, 1], [], []>} : vector<8x8xbf16>, vector<8x32xbf16>, vector<8x32xf32> -> vector<8x32xf32>
    %148 = arith.addf %100, %147 : vector<8x32xf32>
    %c0_111 = arith.constant 0 : index
    %c3 = arith.constant 3 : index
    %c0_112 = arith.constant 0 : index
    %c0_113 = arith.constant 0 : index
    %149 = vector.load %arg3[%c0_111, %c3, %c0_112, %c0_113] : memref<1x4x32x8xbf16, #tpu.memory_space<vmem>>, vector<1x1x32x8xbf16>
    %150 = vector.shape_cast %149 : vector<1x1x32x8xbf16> to vector<32x8xbf16>
    %cst_114 = arith.constant dense<0.000000e+00> : vector<8x8xf32>
    %151 = tpu.matmul %5, %150, %cst_114 {dimension_numbers = #tpu.dot_dimension_numbers<[1], [0], [0], [1], [0, 0, 1, 1], [], []>} : vector<8x32xbf16>, vector<32x8xbf16>, vector<8x8xf32> -> vector<8x8xf32>
    %c0_115 = arith.constant 0 : index
    %c3_116 = arith.constant 3 : index
    %c0_117 = arith.constant 0 : index
    %c0_118 = arith.constant 0 : index
    %152 = vector.load %arg4[%c0_115, %c3_116, %c0_117, %c0_118] : memref<1x4x1x8xf32, #tpu.memory_space<vmem>>, vector<1x1x1x8xf32>
    %153 = vector.shape_cast %152 : vector<1x1x1x8xf32> to vector<1x8xf32>
    %154 = vector.broadcast %153 : vector<1x8xf32> to vector<8x8xf32>
    %155 = arith.addf %151, %154 : vector<8x8xf32>
    %cst_119 = arith.constant 0.353553385 : f32
    %156 = vector.broadcast %cst_119 : f32 to vector<8x8xf32>
    %157 = arith.mulf %155, %156 : vector<8x8xf32>
    %c0_120 = arith.constant 0 : index
    %c3_121 = arith.constant 3 : index
    %c0_122 = arith.constant 0 : index
    %c0_123 = arith.constant 0 : index
    %158 = vector.load %arg5[%c0_120, %c3_121, %c0_122, %c0_123] : memref<1x4x32x8xbf16, #tpu.memory_space<vmem>>, vector<1x1x32x8xbf16>
    %159 = vector.shape_cast %158 : vector<1x1x32x8xbf16> to vector<32x8xbf16>
    %cst_124 = arith.constant dense<0.000000e+00> : vector<8x8xf32>
    %160 = tpu.matmul %5, %159, %cst_124 {dimension_numbers = #tpu.dot_dimension_numbers<[1], [0], [0], [1], [0, 0, 1, 1], [], []>} : vector<8x32xbf16>, vector<32x8xbf16>, vector<8x8xf32> -> vector<8x8xf32>
    %c0_125 = arith.constant 0 : index
    %c3_126 = arith.constant 3 : index
    %c0_127 = arith.constant 0 : index
    %c0_128 = arith.constant 0 : index
    %161 = vector.load %arg6[%c0_125, %c3_126, %c0_127, %c0_128] : memref<1x4x1x8xf32, #tpu.memory_space<vmem>>, vector<1x1x1x8xf32>
    %162 = vector.shape_cast %161 : vector<1x1x1x8xf32> to vector<1x8xf32>
    %163 = vector.broadcast %162 : vector<1x8xf32> to vector<8x8xf32>
    %164 = arith.addf %160, %163 : vector<8x8xf32>
    %c0_129 = arith.constant 0 : index
    %c3_130 = arith.constant 3 : index
    %c0_131 = arith.constant 0 : index
    %c0_132 = arith.constant 0 : index
    %165 = vector.load %arg7[%c0_129, %c3_130, %c0_131, %c0_132] : memref<1x4x32x8xbf16, #tpu.memory_space<vmem>>, vector<1x1x32x8xbf16>
    %166 = vector.shape_cast %165 : vector<1x1x32x8xbf16> to vector<32x8xbf16>
    %cst_133 = arith.constant dense<0.000000e+00> : vector<8x8xf32>
    %167 = tpu.matmul %5, %166, %cst_133 {dimension_numbers = #tpu.dot_dimension_numbers<[1], [0], [0], [1], [0, 0, 1, 1], [], []>} : vector<8x32xbf16>, vector<32x8xbf16>, vector<8x8xf32> -> vector<8x8xf32>
    %c0_134 = arith.constant 0 : index
    %c3_135 = arith.constant 3 : index
    %c0_136 = arith.constant 0 : index
    %c0_137 = arith.constant 0 : index
    %168 = vector.load %arg8[%c0_134, %c3_135, %c0_136, %c0_137] : memref<1x4x1x8xf32, #tpu.memory_space<vmem>>, vector<1x1x1x8xf32>
    %169 = vector.shape_cast %168 : vector<1x1x1x8xf32> to vector<1x8xf32>
    %170 = vector.broadcast %169 : vector<1x8xf32> to vector<8x8xf32>
    %171 = arith.addf %167, %170 : vector<8x8xf32>
    %172 = arith.truncf %157 : vector<8x8xf32> to vector<8x8xbf16>
    %173 = vector.shape_cast %172 : vector<8x8xbf16> to vector<1x8x8xbf16>
    %174 = arith.truncf %164 : vector<8x8xf32> to vector<8x8xbf16>
    %175 = vector.shape_cast %174 : vector<8x8xbf16> to vector<1x8x8xbf16>
    %176 = arith.truncf %171 : vector<8x8xf32> to vector<8x8xbf16>
    %177 = vector.shape_cast %176 : vector<8x8xbf16> to vector<1x8x8xbf16>
    "tpu.trace_start"() <{level = 10 : i32, message = "bqd,bkd->bqk"}> : () -> ()
    %cst_138 = arith.constant dense<0.000000e+00> : vector<1x8x8xf32>
    %178 = tpu.matmul %173, %175, %cst_138 {dimension_numbers = #tpu.dot_dimension_numbers<[2], [2], [1], [1], [0, 0, 0, 1, 1, 1], [0], [0]>} : vector<1x8x8xbf16>, vector<1x8x8xbf16>, vector<1x8x8xf32> -> vector<1x8x8xf32>
    "tpu.trace_stop"() : () -> ()
    %cst_139 = arith.constant dense<0xFF800000> : vector<1x8xf32>
    %179 = vector.multi_reduction <maximumf>, %178, %cst_139 [2] : vector<1x8x8xf32> to vector<1x8xf32>
    %180 = vector.shape_cast %179 : vector<1x8xf32> to vector<1x8x1xf32>
    %181 = vector.broadcast %180 : vector<1x8x1xf32> to vector<1x8x8xf32>
    %182 = arith.subf %178, %181 : vector<1x8x8xf32>
    %183 = math.exp %182 : vector<1x8x8xf32>
    %cst_140 = arith.constant dense<0.000000e+00> : vector<1x8xf32>
    %184 = vector.multi_reduction <add>, %183, %cst_140 [2] : vector<1x8x8xf32> to vector<1x8xf32>
    %185 = vector.shape_cast %184 : vector<1x8xf32> to vector<1x8x1xf32>
    %186 = tpu.reciprocal %185 {approx = true} : vector<1x8x1xf32> -> vector<1x8x1xf32>
    %187 = vector.broadcast %186 : vector<1x8x1xf32> to vector<1x8x8xf32>
    %188 = arith.mulf %183, %187 : vector<1x8x8xf32>
    %189 = arith.truncf %188 : vector<1x8x8xf32> to vector<1x8x8xbf16>
    "tpu.trace_start"() <{level = 10 : i32, message = "bqk,bkd->bqd"}> : () -> ()
    %cst_141 = arith.constant dense<0.000000e+00> : vector<1x8x8xf32>
    %190 = tpu.matmul %189, %177, %cst_141 {dimension_numbers = #tpu.dot_dimension_numbers<[2], [1], [1], [2], [0, 0, 0, 1, 1, 2], [0], [0]>} : vector<1x8x8xbf16>, vector<1x8x8xbf16>, vector<1x8x8xf32> -> vector<1x8x8xf32>
    "tpu.trace_stop"() : () -> ()
    %191 = vector.shape_cast %190 : vector<1x8x8xf32> to vector<8x8xf32>
    %192 = arith.truncf %191 : vector<8x8xf32> to vector<8x8xbf16>
    %c0_142 = arith.constant 0 : index
    %c3_143 = arith.constant 3 : index
    %c0_144 = arith.constant 0 : index
    %c0_145 = arith.constant 0 : index
    %193 = vector.load %arg9[%c0_142, %c3_143, %c0_144, %c0_145] : memref<1x4x8x32xbf16, #tpu.memory_space<vmem>>, vector<1x1x8x32xbf16>
    %194 = vector.shape_cast %193 : vector<1x1x8x32xbf16> to vector<8x32xbf16>
    %cst_146 = arith.constant dense<0.000000e+00> : vector<8x32xf32>
    %195 = tpu.matmul %192, %194, %cst_146 {dimension_numbers = #tpu.dot_dimension_numbers<[1], [0], [0], [1], [0, 0, 1, 1], [], []>} : vector<8x8xbf16>, vector<8x32xbf16>, vector<8x32xf32> -> vector<8x32xf32>
    %196 = arith.addf %148, %195 : vector<8x32xf32>
    %c0_147 = arith.constant 0 : index
    %c0_148 = arith.constant 0 : index
    %c0_149 = arith.constant 0 : index
    %197 = vector.load %arg10[%c0_147, %c0_148, %c0_149] : memref<1x1x32xf32, #tpu.memory_space<vmem>>, vector<1x1x32xf32>
    %198 = vector.shape_cast %197 : vector<1x1x32xf32> to vector<1x32xf32>
    %199 = vector.broadcast %198 : vector<1x32xf32> to vector<8x32xf32>
    %200 = arith.addf %196, %199 : vector<8x32xf32>
    %201 = arith.addf %4, %200 : vector<8x32xf32>
    %202 = vector.shape_cast %201 : vector<8x32xf32> to vector<1x8x32xf32>
    %c0_150 = arith.constant 0 : index
    %c0_151 = arith.constant 0 : index
    %c0_152 = arith.constant 0 : index
    %203 = vector.load %arg15[%c0_150, %c0_151, %c0_152] : memref<1x8x32xf32, #tpu.memory_space<vmem>>, vector<1x8x32xf32>
    %204 = vector.shape_cast %203 : vector<1x8x32xf32> to vector<8x32xf32>
    %c0_153 = arith.constant 0 : index
    %c0_154 = arith.constant 0 : index
    %c0_155 = arith.constant 0 : index
    %205 = vector.load %arg16[%c0_153, %c0_154, %c0_155] : memref<1x8x32xf32, #tpu.memory_space<vmem>>, vector<1x8x32xf32>
    %206 = vector.shape_cast %205 : vector<1x8x32xf32> to vector<8x32xf32>
    %cst_156 = arith.constant dense<0.000000e+00> : vector<1x8xf32>
    %207 = vector.multi_reduction <add>, %202, %cst_156 [2] : vector<1x8x32xf32> to vector<1x8xf32>
    %208 = vector.shape_cast %207 : vector<1x8xf32> to vector<1x8x1xf32>
    %cst_157 = arith.constant dense<0.000000e+00> : vector<1x1xf32>
    %209 = vector.multi_reduction <add>, %208, %cst_157 [1] : vector<1x8x1xf32> to vector<1x1xf32>
    %210 = vector.shape_cast %209 : vector<1x1xf32> to vector<1x1x1xf32>
    %211 = arith.mulf %202, %202 : vector<1x8x32xf32>
    %cst_158 = arith.constant dense<0.000000e+00> : vector<1x8xf32>
    %212 = vector.multi_reduction <add>, %211, %cst_158 [2] : vector<1x8x32xf32> to vector<1x8xf32>
    %213 = vector.shape_cast %212 : vector<1x8xf32> to vector<1x8x1xf32>
    %cst_159 = arith.constant dense<0.000000e+00> : vector<1x1xf32>
    %214 = vector.multi_reduction <add>, %213, %cst_159 [1] : vector<1x8x1xf32> to vector<1x1xf32>
    %215 = vector.shape_cast %214 : vector<1x1xf32> to vector<1x1x1xf32>
    %cst_160 = arith.constant 3.906250e-03 : f32
    %216 = vector.broadcast %cst_160 : f32 to vector<1x1x1xf32>
    %217 = arith.mulf %210, %216 : vector<1x1x1xf32>
    %cst_161 = arith.constant 3.906250e-03 : f32
    %218 = vector.broadcast %cst_161 : f32 to vector<1x1x1xf32>
    %219 = arith.mulf %215, %218 : vector<1x1x1xf32>
    %220 = arith.mulf %217, %217 : vector<1x1x1xf32>
    %221 = arith.subf %219, %220 : vector<1x1x1xf32>
    %222 = vector.broadcast %217 : vector<1x1x1xf32> to vector<1x8x32xf32>
    %223 = arith.subf %202, %222 : vector<1x8x32xf32>
    %cst_162 = arith.constant 9.99999997E-7 : f32
    %224 = vector.broadcast %cst_162 : f32 to vector<1x1x1xf32>
    %225 = arith.addf %221, %224 : vector<1x1x1xf32>
    %226 = math.rsqrt %225 : vector<1x1x1xf32>
    %227 = vector.broadcast %226 : vector<1x1x1xf32> to vector<1x8x32xf32>
    %228 = arith.mulf %223, %227 : vector<1x8x32xf32>
    %229 = vector.shape_cast %204 : vector<8x32xf32> to vector<1x8x32xf32>
    %230 = arith.mulf %228, %229 : vector<1x8x32xf32>
    %231 = vector.shape_cast %206 : vector<8x32xf32> to vector<1x8x32xf32>
    %232 = arith.addf %230, %231 : vector<1x8x32xf32>
    %233 = vector.shape_cast %232 : vector<1x8x32xf32> to vector<8x32xf32>
    %234 = arith.truncf %233 : vector<8x32xf32> to vector<8x32xbf16>
    %c0_163 = arith.constant 0 : index
    %c0_164 = arith.constant 0 : index
    %c0_165 = arith.constant 0 : index
    %235 = vector.load %arg11[%c0_163, %c0_164, %c0_165] : memref<1x32x64xbf16, #tpu.memory_space<vmem>>, vector<1x32x64xbf16>
    %236 = vector.shape_cast %235 : vector<1x32x64xbf16> to vector<32x64xbf16>
    %cst_166 = arith.constant dense<0.000000e+00> : vector<8x64xf32>
    %237 = tpu.matmul %234, %236, %cst_166 {dimension_numbers = #tpu.dot_dimension_numbers<[1], [0], [0], [1], [0, 0, 1, 1], [], []>} : vector<8x32xbf16>, vector<32x64xbf16>, vector<8x64xf32> -> vector<8x64xf32>
    %c0_167 = arith.constant 0 : index
    %c0_168 = arith.constant 0 : index
    %c0_169 = arith.constant 0 : index
    %238 = vector.load %arg12[%c0_167, %c0_168, %c0_169] : memref<1x1x64xf32, #tpu.memory_space<vmem>>, vector<1x1x64xf32>
    %239 = vector.shape_cast %238 : vector<1x1x64xf32> to vector<1x64xf32>
    %240 = vector.broadcast %239 : vector<1x64xf32> to vector<8x64xf32>
    %241 = arith.addf %237, %240 : vector<8x64xf32>
    %cst_170 = arith.constant 0.000000e+00 : f32
    %242 = vector.broadcast %cst_170 : f32 to vector<8x64xf32>
    %243 = arith.maximumf %241, %242 : vector<8x64xf32>
    %244 = arith.truncf %243 : vector<8x64xf32> to vector<8x64xbf16>
    %c0_171 = arith.constant 0 : index
    %c0_172 = arith.constant 0 : index
    %c0_173 = arith.constant 0 : index
    %245 = vector.load %arg13[%c0_171, %c0_172, %c0_173] : memref<1x64x32xbf16, #tpu.memory_space<vmem>>, vector<1x64x32xbf16>
    %246 = vector.shape_cast %245 : vector<1x64x32xbf16> to vector<64x32xbf16>
    %cst_174 = arith.constant dense<0.000000e+00> : vector<8x32xf32>
    %247 = tpu.matmul %244, %246, %cst_174 {dimension_numbers = #tpu.dot_dimension_numbers<[1], [0], [0], [1], [0, 0, 1, 1], [], []>} : vector<8x64xbf16>, vector<64x32xbf16>, vector<8x32xf32> -> vector<8x32xf32>
    %c0_175 = arith.constant 0 : index
    %c0_176 = arith.constant 0 : index
    %c0_177 = arith.constant 0 : index
    %248 = vector.load %arg14[%c0_175, %c0_176, %c0_177] : memref<1x1x32xf32, #tpu.memory_space<vmem>>, vector<1x1x32xf32>
    %249 = vector.shape_cast %248 : vector<1x1x32xf32> to vector<1x32xf32>
    %250 = vector.broadcast %249 : vector<1x32xf32> to vector<8x32xf32>
    %251 = arith.addf %247, %250 : vector<8x32xf32>
    %252 = arith.addf %233, %251 : vector<8x32xf32>
    %253 = vector.shape_cast %252 : vector<8x32xf32> to vector<1x8x32xf32>
    %c0_178 = arith.constant 0 : index
    %c0_179 = arith.constant 0 : index
    %c0_180 = arith.constant 0 : index
    %254 = vector.load %arg17[%c0_178, %c0_179, %c0_180] : memref<1x8x32xf32, #tpu.memory_space<vmem>>, vector<1x8x32xf32>
    %255 = vector.shape_cast %254 : vector<1x8x32xf32> to vector<8x32xf32>
    %c0_181 = arith.constant 0 : index
    %c0_182 = arith.constant 0 : index
    %c0_183 = arith.constant 0 : index
    %256 = vector.load %arg18[%c0_181, %c0_182, %c0_183] : memref<1x8x32xf32, #tpu.memory_space<vmem>>, vector<1x8x32xf32>
    %257 = vector.shape_cast %256 : vector<1x8x32xf32> to vector<8x32xf32>
    %cst_184 = arith.constant dense<0.000000e+00> : vector<1x8xf32>
    %258 = vector.multi_reduction <add>, %253, %cst_184 [2] : vector<1x8x32xf32> to vector<1x8xf32>
    %259 = vector.shape_cast %258 : vector<1x8xf32> to vector<1x8x1xf32>
    %cst_185 = arith.constant dense<0.000000e+00> : vector<1x1xf32>
    %260 = vector.multi_reduction <add>, %259, %cst_185 [1] : vector<1x8x1xf32> to vector<1x1xf32>
    %261 = vector.shape_cast %260 : vector<1x1xf32> to vector<1x1x1xf32>
    %262 = arith.mulf %253, %253 : vector<1x8x32xf32>
    %cst_186 = arith.constant dense<0.000000e+00> : vector<1x8xf32>
    %263 = vector.multi_reduction <add>, %262, %cst_186 [2] : vector<1x8x32xf32> to vector<1x8xf32>
    %264 = vector.shape_cast %263 : vector<1x8xf32> to vector<1x8x1xf32>
    %cst_187 = arith.constant dense<0.000000e+00> : vector<1x1xf32>
    %265 = vector.multi_reduction <add>, %264, %cst_187 [1] : vector<1x8x1xf32> to vector<1x1xf32>
    %266 = vector.shape_cast %265 : vector<1x1xf32> to vector<1x1x1xf32>
    %cst_188 = arith.constant 3.906250e-03 : f32
    %267 = vector.broadcast %cst_188 : f32 to vector<1x1x1xf32>
    %268 = arith.mulf %261, %267 : vector<1x1x1xf32>
    %cst_189 = arith.constant 3.906250e-03 : f32
    %269 = vector.broadcast %cst_189 : f32 to vector<1x1x1xf32>
    %270 = arith.mulf %266, %269 : vector<1x1x1xf32>
    %271 = arith.mulf %268, %268 : vector<1x1x1xf32>
    %272 = arith.subf %270, %271 : vector<1x1x1xf32>
    %273 = vector.broadcast %268 : vector<1x1x1xf32> to vector<1x8x32xf32>
    %274 = arith.subf %253, %273 : vector<1x8x32xf32>
    %cst_190 = arith.constant 9.99999997E-7 : f32
    %275 = vector.broadcast %cst_190 : f32 to vector<1x1x1xf32>
    %276 = arith.addf %272, %275 : vector<1x1x1xf32>
    %277 = math.rsqrt %276 : vector<1x1x1xf32>
    %278 = vector.broadcast %277 : vector<1x1x1xf32> to vector<1x8x32xf32>
    %279 = arith.mulf %274, %278 : vector<1x8x32xf32>
    %280 = vector.shape_cast %255 : vector<8x32xf32> to vector<1x8x32xf32>
    %281 = arith.mulf %279, %280 : vector<1x8x32xf32>
    %282 = vector.shape_cast %257 : vector<8x32xf32> to vector<1x8x32xf32>
    %283 = arith.addf %281, %282 : vector<1x8x32xf32>
    %c0_191 = arith.constant 0 : index
    %c0_192 = arith.constant 0 : index
    %c0_193 = arith.constant 0 : index
    %284 = vector.load %arg20[%c0_191, %c0_192, %c0_193] : memref<1x8x32xf32, #tpu.memory_space<vmem>>, vector<1x8x32xf32>
    tpu.vector_store %arg20[%c0_191, %c0_192, %c0_193], %283 {strides = array<i32>} : memref<1x8x32xf32, #tpu.memory_space<vmem>>, vector<1x8x32xf32>,
    %c1_i32 = arith.constant 1 : i32
    %285 = arith.cmpi eq, %arg1, %c1_i32 : i32
    %286 = arith.extui %285 : i1 to i32
    %c0_i32_194 = arith.constant 0 : i32
    %287 = arith.cmpi ne, %286, %c0_i32_194 : i32
    scf.if %287 {
      %c0_195 = arith.constant 0 : index
      %c0_196 = arith.constant 0 : index
      %c0_197 = arith.constant 0 : index
      %288 = vector.load %arg19[%c0_195, %c0_196, %c0_197] : memref<1x8x32xf32, #tpu.memory_space<vmem>>, vector<1x8x32xf32>
      tpu.vector_store %arg19[%c0_195, %c0_196, %c0_197], %283 {strides = array<i32>} : memref<1x8x32xf32, #tpu.memory_space<vmem>>, vector<1x8x32xf32>,
    } else {
    }
    return
  }
  func.func @transform_0(%arg0: i32, %arg1: i32) -> (i32, i32, i32) {
    %c0_i32 = arith.constant 0 : i32
    %c0_i32_0 = arith.constant 0 : i32
    %c0_i32_1 = arith.constant 0 : i32
    return %arg0, %c0_i32, %c0_i32_0 : i32, i32, i32
  }
  func.func @transform_1(%arg0: i32, %arg1: i32) -> (i32, i32, i32, i32) {
    %c0_i32 = arith.constant 0 : i32
    %c0_i32_0 = arith.constant 0 : i32
    %c0_i32_1 = arith.constant 0 : i32
    %c0_i32_2 = arith.constant 0 : i32
    return %arg1, %c0_i32, %c0_i32_0, %c0_i32_1 : i32, i32, i32, i32
  }
  func.func @transform_2(%arg0: i32, %arg1: i32) -> (i32, i32, i32, i32) {
    %c0_i32 = arith.constant 0 : i32
    %c0_i32_0 = arith.constant 0 : i32
    %c0_i32_1 = arith.constant 0 : i32
    %c0_i32_2 = arith.constant 0 : i32
    return %arg1, %c0_i32, %c0_i32_0, %c0_i32_1 : i32, i32, i32, i32
  }
  func.func @transform_3(%arg0: i32, %arg1: i32) -> (i32, i32, i32, i32) {
    %c0_i32 = arith.constant 0 : i32
    %c0_i32_0 = arith.constant 0 : i32
    %c0_i32_1 = arith.constant 0 : i32
    %c0_i32_2 = arith.constant 0 : i32
    return %arg1, %c0_i32, %c0_i32_0, %c0_i32_1 : i32, i32, i32, i32
  }
  func.func @transform_4(%arg0: i32, %arg1: i32) -> (i32, i32, i32, i32) {
    %c0_i32 = arith.constant 0 : i32
    %c0_i32_0 = arith.constant 0 : i32
    %c0_i32_1 = arith.constant 0 : i32
    %c0_i32_2 = arith.constant 0 : i32
    return %arg1, %c0_i32, %c0_i32_0, %c0_i32_1 : i32, i32, i32, i32
  }
  func.func @transform_5(%arg0: i32, %arg1: i32) -> (i32, i32, i32, i32) {
    %c0_i32 = arith.constant 0 : i32
    %c0_i32_0 = arith.constant 0 : i32
    %c0_i32_1 = arith.constant 0 : i32
    %c0_i32_2 = arith.constant 0 : i32
    return %arg1, %c0_i32, %c0_i32_0, %c0_i32_1 : i32, i32, i32, i32
  }
  func.func @transform_6(%arg0: i32, %arg1: i32) -> (i32, i32, i32, i32) {
    %c0_i32 = arith.constant 0 : i32
    %c0_i32_0 = arith.constant 0 : i32
    %c0_i32_1 = arith.constant 0 : i32
    %c0_i32_2 = arith.constant 0 : i32
    return %arg1, %c0_i32, %c0_i32_0, %c0_i32_1 : i32, i32, i32, i32
  }
  func.func @transform_7(%arg0: i32, %arg1: i32) -> (i32, i32, i32, i32) {
    %c0_i32 = arith.constant 0 : i32
    %c0_i32_0 = arith.constant 0 : i32
    %c0_i32_1 = arith.constant 0 : i32
    %c0_i32_2 = arith.constant 0 : i32
    return %arg1, %c0_i32, %c0_i32_0, %c0_i32_1 : i32, i32, i32, i32
  }
  func.func @transform_8(%arg0: i32, %arg1: i32) -> (i32, i32, i32) {
    %c0_i32 = arith.constant 0 : i32
    %c0_i32_0 = arith.constant 0 : i32
    %c0_i32_1 = arith.constant 0 : i32
    return %arg1, %c0_i32, %c0_i32_0 : i32, i32, i32
  }
  func.func @transform_9(%arg0: i32, %arg1: i32) -> (i32, i32, i32) {
    %c0_i32 = arith.constant 0 : i32
    %c0_i32_0 = arith.constant 0 : i32
    %c0_i32_1 = arith.constant 0 : i32
    return %arg1, %c0_i32, %c0_i32_0 : i32, i32, i32
  }
  func.func @transform_10(%arg0: i32, %arg1: i32) -> (i32, i32, i32) {
    %c0_i32 = arith.constant 0 : i32
    %c0_i32_0 = arith.constant 0 : i32
    %c0_i32_1 = arith.constant 0 : i32
    return %arg1, %c0_i32, %c0_i32_0 : i32, i32, i32
  }
  func.func @transform_11(%arg0: i32, %arg1: i32) -> (i32, i32, i32) {
    %c0_i32 = arith.constant 0 : i32
    %c0_i32_0 = arith.constant 0 : i32
    %c0_i32_1 = arith.constant 0 : i32
    return %arg1, %c0_i32, %c0_i32_0 : i32, i32, i32
  }
  func.func @transform_12(%arg0: i32, %arg1: i32) -> (i32, i32, i32) {
    %c0_i32 = arith.constant 0 : i32
    %c0_i32_0 = arith.constant 0 : i32
    %c0_i32_1 = arith.constant 0 : i32
    return %arg1, %c0_i32, %c0_i32_0 : i32, i32, i32
  }
  func.func @transform_13(%arg0: i32, %arg1: i32) -> (i32, i32, i32) {
    %c0_i32 = arith.constant 0 : i32
    %c0_i32_0 = arith.constant 0 : i32
    %c0_i32_1 = arith.constant 0 : i32
    return %arg1, %c0_i32, %c0_i32_0 : i32, i32, i32
  }
  func.func @transform_14(%arg0: i32, %arg1: i32) -> (i32, i32, i32) {
    %c0_i32 = arith.constant 0 : i32
    %c0_i32_0 = arith.constant 0 : i32
    %c0_i32_1 = arith.constant 0 : i32
    return %arg1, %c0_i32, %c0_i32_0 : i32, i32, i32
  }
  func.func @transform_15(%arg0: i32, %arg1: i32) -> (i32, i32, i32) {
    %c0_i32 = arith.constant 0 : i32
    %c0_i32_0 = arith.constant 0 : i32
    %c0_i32_1 = arith.constant 0 : i32
    return %arg1, %c0_i32, %c0_i32_0 : i32, i32, i32
  }
  func.func @transform_16(%arg0: i32, %arg1: i32) -> (i32, i32, i32) {
    %c0_i32 = arith.constant 0 : i32
    %c0_i32_0 = arith.constant 0 : i32
    %c0_i32_1 = arith.constant 0 : i32
    return %arg1, %c0_i32, %c0_i32_0 : i32, i32, i32
  }
  func.func @transform_17(%arg0: i32, %arg1: i32) -> (i32, i32, i32) {
    %c0_i32 = arith.constant 0 : i32
    %c0_i32_0 = arith.constant 0 : i32
    %c0_i32_1 = arith.constant 0 : i32
    return %arg0, %c0_i32, %c0_i32_0 : i32, i32, i32
  }
}

</mosaic_0001>

<bundles_post_ra>
// kernel: tpu_custom_call.1
= control target key start
LH: loop header
LB: loop body
LE: loop exit
PB: predicated region body
PF: predicated region fallthrough
CT: control target
= control target key end

     0   :  { %s3950_s0 = inlined_call_operand.vmem [shape: f32[2,8,32], index: 0, kind: input, shape index: {}]   ;;  %s3951_s1 = inlined_call_operand.vmem [shape: bf16[2,4,32,8], index: 1, kind: input, shape index: {}]   ;;  %s3952_s2 = inlined_call_operand.vmem [shape: f32[2,4,1,8], index: 2, kind: input, shape index: {}]   ;;  %s3953_s3 = inlined_call_operand.vmem [shape: bf16[2,4,32,8], index: 3, kind: input, shape index: {}]   ;;  %s3954_s4 = inlined_call_operand.vmem [shape: f32[2,4,1,8], index: 4, kind: input, shape index: {}]   ;;  %s3955_s5 = inlined_call_operand.vmem [shape: bf16[2,4,32,8], index: 5, kind: input, shape index: {}]   ;;  %s3956_s6 = inlined_call_operand.vmem [shape: f32[2,4,1,8], index: 6, kind: input, shape index: {}]   ;;  %s3957_s7 = inlined_call_operand.vmem [shape: bf16[2,4,8,32], index: 7, kind: input, shape index: {}]   ;;  %s3958_s8 = inlined_call_operand.vmem [shape: f32[2,1,32], index: 8, kind: input, shape index: {}]   ;;  %s3959_s9 = inlined_call_operand.vmem [shape: bf16[2,32,64], index: 9, kind: input, shape index: {}]   ;;  %s3960_s10 = inlined_call_operand.vmem [shape: f32[2,1,64], index: 10, kind: input, shape index: {}]   ;;  %s3961_s11 = inlined_call_operand.vmem [shape: bf16[2,64,32], index: 11, kind: input, shape index: {}]   ;;  %s3962_s12 = inlined_call_operand.vmem [shape: f32[2,1,32], index: 12, kind: input, shape index: {}]   ;;  %s3963_s13 = inlined_call_operand.vmem [shape: f32[2,8,32], index: 13, kind: input, shape index: {}]   ;;  %s3964_s14 = inlined_call_operand.vmem [shape: f32[2,8,32], index: 14, kind: input, shape index: {}]   ;;  %s3965_s15 = inlined_call_operand.vmem [shape: f32[2,8,32], index: 15, kind: input, shape index: {}]   ;;  %s3966_s16 = inlined_call_operand.vmem [shape: f32[2,8,32], index: 16, kind: input, shape index: {}]   ;;  %s3967_s17 = inlined_call_operand.hbm [shape: f32[2,8,32], index: 17, kind: output, shape index: {}]  }
   0x1   :  { %3985 = sst [smem:[#allocation21_spill]] %s3950_s0 }
   0x2   :  { %3986 = sst [smem:[#allocation22_spill]] %s3951_s1 }
   0x3   :  { %3987 = sst [smem:[#allocation23_spill]] %s3952_s2 }
   0x4   :  { %3988 = sst [smem:[#allocation24_spill]] %s3953_s3 }
   0x5   :  { %3989 = sst [smem:[#allocation25_spill]] %s3954_s4 }
   0x6   :  { %3990 = sst [smem:[#allocation26_spill]] %s3955_s5 }
   0x7   :  { %3991 = sst [smem:[#allocation27_spill]] %s3956_s6 }
   0x8   :  { %3992 = sst [smem:[#allocation28_spill]] %s3957_s7 }
   0x9   :  { %3993 = sst [smem:[#allocation29_spill]] %s3959_s9 }
   0xa   :  { %3994 = sst [smem:[#allocation30_spill]] %s3961_s11 }
   0xb   :  { %3995 = sst [smem:[#allocation31_spill]] %s3962_s12 }
   0xc   :  { %3996 = sst [smem:[#allocation32_spill]] %s3964_s14 }
   0xd   :  { %3997 = sst [smem:[#allocation33_spill]] %s3965_s15 }
   0xe   :  { %3998 = sst [smem:[#allocation34_spill]] %s3966_s16 }
   0xf   :  { %3999 = sst [smem:[#allocation35_spill]] %s3967_s17 }
  0x10   :  { %22 = vsyncpa [#allocation4], 0 }
  0x11   :  { %24 = vsyncpa [#allocation4 + $0x1], 0  ;;  %s3476_s24 = smov 0   ;;  %s3478_s25 = smov 0  }
  0x12   :  { %s3480_s26 = smov 0   ;;  %s3482_s27 = smov 0  }
  0x13   :  { %s3484_s28 = smov 0   ;;  %s3486_s29 = smov 0  }
  0x14   :  { %s3488_s0 = smov 0   ;;  %s3490_s30 = smov 0  }
  0x15 LB: > { %4000 = sst [smem:[#allocation6_spill]] %s3353_s24  ;;  %s2753_s18 = sadd.s32 4294967295, %s3381_s30   ;;  %s3381_s30 = sphi %s3490_s30, %s30_s30   ;;  %s3377_s0 = sphi %s3488_s0, %s4056_s0   ;;  %s3373_s29 = sphi %s3486_s29, %s4055_s29   ;;  %s3369_s28 = sphi %s3484_s28, %s4054_s28   ;;  %s3365_s27 = sphi %s3482_s27, %s4053_s27   ;;  %s3361_s26 = sphi %s3480_s26, %s4052_s26   ;;  %s3357_s25 = sphi %s3478_s25, %s4051_s25   ;;  %s3353_s24 = sphi %s3476_s24, %s4050_s24  }
  0x16   : > { %4001 = sst [smem:[#allocation7_spill]] %s3357_s25  ;;  %s2754_s19 = sadd.s32 4294967294, %s3381_s30  }
  0x17   : > { %4002 = sst [smem:[#allocation8_spill]] %s3361_s26  ;;  %s39_s1 = sadd.s32 1, %s3373_s29 }
  0x18   : > { %4003 = sst [smem:[#allocation9_spill]] %s3365_s27  ;;  %p40_p0 = scmp.ge.s32.totalorder %s39_s1, 2 }
  0x19   : > { %4004 = sst [smem:[#allocation10_spill]] %s3369_s28  ;;  %s42_s20 = sadd.s32 1, %s3377_s0 }
  0x1a   : > { %4005 = sst [smem:[#allocation11_spill]] %s3373_s29  ;;  %p501_p1 = scmp.ne.s32.totalorder %s3361_s26, %s3357_s25 }
  0x1b   : > { %4006 = sst [smem:[#allocation12_spill]] %s3377_s0  ;;  %p502_p2 = scmp.eq.s32.totalorder %s2753_s18, 3 }
  0x1c   : > { %4007 = sst [smem:[#allocation13_spill]] %s3381_s30  ;;  %s4058_s1 = smov (%p40_p0, %s39_s1), 0 }
  0x1d   : > { %4008 = sst [smem:[#allocation14_spill]] %s4058_s1  ;;  %s4060_s20 = smov (!%p40_p0, %s42_s20), %s3377_s0 }
  0x1e   : > { %p3525_p3 = por %p502_p2, %p501_p1  ;;  %p507_p4 = scmp.ne.s32.totalorder %s3357_s25, %s3353_s24 }
  0x1f   : > { %p44_p5 = scmp.ge.s32.totalorder %s4060_s20, 2  ;;  %p508_p6 = scmp.eq.s32.totalorder %s2754_s19, 3 }
  0x20   : > { %s4009_s21 = scalar_select %p3525_p3, 1, 0 }
  0x21   : > { %p2757_p7 = scmp.ge.s32.totalorder %s3381_s30, 1  ;;  %p648_p8 = scmp.lt.s32.totalorder %s3381_s30, 5 }
  0x22   : > { %4010 = sst [smem:[#allocation15_spill]] %s4009_s21  ;;  %s4062_s20 = smov (%p44_p5, %s4060_s20), 0 }
  0x23   : > { %4011 = sst [smem:[#allocation16_spill]] %s4062_s20  ;;  %p3535_p9 = por %p508_p6, %p507_p4 }
  0x24   : > { %p649_p10 = pnand %p2757_p7, %p648_p8  ;;  %s488_s23 = ssub.s32 %s3377_s0, %s4062_s20 }
  0x25   : > { %s4012_s22 = scalar_select %p3535_p9, 1, 0 }
  0x26   : > { %s491_s18 = sadd.s32 1, %s3361_s26  ;;  %p489_p11 = scmp.eq.s32.totalorder %s488_s23, 0 }
  0x27   : > { %4013 = sst [smem:[#allocation17_spill]] %s4012_s22  ;;  %652 = sbr.rel (%p649_p10) target bundleno = 4523 (0x11ab), region = 88 }
  0x28   : > { %s3543_s1 = scalar_select %p489_p11, %s3361_s26, %s491_s18  }
  0x2a   : > { %4014 = sst [smem:[#allocation18_spill]] %s3543_s1 }
  0x2c   : > { %s3976_s19 = sand.u32 1, %s3357_s25   ;;  %p766_p12 = scmp.lt.s32.totalorder %s3369_s28, 1 }
  0x2d   : > { %s3549_s29 = sshll.u32 %s3976_s19, 3  ;;  %p770_p13 = scmp.lt.s32.totalorder %s3365_s27, 1 }
  0x2e   : > { %s767_s22 = scalar_select %p766_p12, %s3369_s28, 1 }
  0x2f   : > { %s3554_s24 = scalar_select %p770_p13, %s3365_s27, 1 }
  0x30   : > { %s2759_s23 = sshll.u32 %s767_s22, 3  ;;  %s4015_s0 = sld [smem:[#allocation21_spill]] }
  0x31   : > { %s2904_s26 = sshll.u32 %s3554_s24, 6  ;;  %s4016_s17 = sld [smem:[#allocation22_spill]] }
  0x32   : > { %s2762_s25 = sshll.u32 %s3554_s24, 2  ;;  %s4017_s2 = sld [smem:[#allocation23_spill]] }
  0x33   : > { %s4018_s3 = sld [smem:[#allocation24_spill]]  ;;  %s2909_s18 = sshll.u32 %s3554_s24, 5 }
  0x34   : > { %s4019_s4 = sld [smem:[#allocation25_spill]]  ;;  %s3621_s20 = sshll.u32 %s3554_s24, 3 }
  0x35   : > { %s4021_s5 = sld [smem:[#allocation26_spill]] }
  0x36   : > { %s769_s1 = scalar_lea.vmem %s4015_s0, %s2759_s23  ;;  %s4022_s6 = sld [smem:[#allocation27_spill]] }
  0x37   : > { %s3563_s21 = scalar_lea.vmem %s4016_s17, %s2904_s26  ;;  %s4023_s7 = sld [smem:[#allocation28_spill]] }
  0x38   : > { %s3569_s16 = scalar_lea.vmem %s4017_s2, %s2762_s25  ;;  %s2907_s2 = sshll.u32 %s3554_s24, 4 }
  0x39   : > { %s3574_s14 = scalar_lea.vmem %s4018_s3, %s2904_s26  ;;  %s4025_s9 = sld [smem:[#allocation29_spill]] }
  0x3a   : > { %s3579_s23 = scalar_lea.vmem %s4019_s4, %s2762_s25  ;;  %s4027_s11 = sld [smem:[#allocation30_spill]] }
  0x3b   : > { %4020 = sst [smem:[#allocation19_spill]] %s3579_s23  ;;  %s3584_s17 = scalar_lea.vmem %s4021_s5, %s2904_s26 }
  0x3c   : > { %s3589_s28 = scalar_lea.vmem %s4022_s6, %s2762_s25  ;;  %s824_s5 = scalar_lea.vmem %s3963_s13, %s3621_s20 }
  0x3d   : > { %s3595_s3 = scalar_lea.vmem %s4023_s7, %s2907_s2  ;;  %s4028_s19 = sld [smem:[#allocation32_spill]] }
  0x3e   : > { %4024 = sst [smem:[#allocation20_spill]] %s3595_s3 }
  0x3f   : > { %s3604_s26 = scalar_lea.vmem %s4025_s9, %s2907_s2  ;;  %s4029_s25 = sld [smem:[#allocation33_spill]] }
  0x40   : > { %s3618_s3 = scalar_lea.vmem %s4027_s11, %s2909_s18  ;;  %s4030_s4 = sld [smem:[#allocation34_spill]] }
  0x41   : > { %s765_s11 = scalar_lea.vmem [#allocation3], %s3549_s29  ;;  %s4031_s12 = sld [smem:[#allocation9_spill]] }
  0x43   : > { %s828_s6 = scalar_lea.vmem %s4028_s19, %s3621_s20 }
  0x45   : > { %s832_s7 = scalar_lea.vmem %s4029_s25, %s3621_s20 }
  0x46   : > { %s836_s9 = scalar_lea.vmem %s4030_s4, %s3621_s20 }
  0x47   : > { %p2779_p0 = scmp.ne.s32.totalorder %s4031_s12, 0 }
  0x49   : > { %841 = sbr.rel (%p2779_p0) target bundleno = 80 (0x50), region = 92 }
  0x4e   : > { %v842_v0 = vld [vmem:[%s769_s1] sm:$0xff]  ;;  %vm843_vm0 = vcmask 261120  }
  0x4f   : > { %844 = vst.msk [vmem:[#allocation2] sm:$0xff] %vm843_vm0, %v842_v0 }
  0x50 PF: > { %v3239_v1 = vld [vmem:[%s3563_s21 + $0x8] sm:$0xff]   ;;  %v3383_v2 = vmov 0.0   ;;  %v3241_v4 = vld [vmem:[%s3563_s21] sm:$0xff]   ;;  %vm3384_vm1 = vmmov 0   ;;  %s4032_s4 = sld [smem:[#allocation19_spill]]  ;;  %vm870_vm2 = vcmask 261120   ;;  %s4034_s1 = scalar_lea.vmem %s3958_s8, %s3554_s24 }
  0x51   : > { %2978 = vmatprep.subr.bf16.mxu0 %v3383_v2  ;;  %2986 = vmatprep.subr.bf16.mxu1 %v3383_v2  ;;  %v3240_v3 = vld [vmem:[%s3574_s14 + $0x8] sm:$0xff]   ;;  %v3242_v5 = vld [vmem:[%s3574_s14] sm:$0xff]   ;;  %vm1044_vm3 = vcmask 64512   ;;  %vm1106_vm4 = vcmask 1043456   ;;  %v3245_v44 = vld [vmem:[%s3563_s21 + $0x18] sm:$0xff]   ;;  %s4033_s12 = sld [smem:[#allocation20_spill]]  ;;  %s4036_s2 = scalar_lea.vmem %s3960_s10, %s3554_s24 }
  0x52   : > { %2979 = vmatpush3.bf16.msra.mxu0 %v3239_v1  ;;  %2982 = vmatprep.mubr.msk.bf16.mxu0 %vm3384_vm1, %v3383_v2  ;;  %v2780_v8 = vld [vmem:[%s3569_s16] ss:$0 sm:$0xff]  ;;  %v3243_v24 = vld [vmem:[%s3584_s17 + $0x8] sm:$0xff]   ;;  %v3247_v45 = vld [vmem:[%s3563_s21 + $0x10] sm:$0xff]   ;;  %vm2404_vm5 = vcmask 523264   ;;  %s4037_s30 = sld [smem:[#allocation31_spill]] }
  0x53   : > { %2987 = vmatpush3.bf16.msra.mxu1 %v3240_v3  ;;  %2980 = vmatprep.subr.bf16.mxu0 %v3383_v2  ;;  %v3244_v25 = vld [vmem:[%s3584_s17] sm:$0xff]   ;;  %v3246_v49 = vld [vmem:[%s3574_s14 + $0x18] sm:$0xff]   ;;  %v3248_v51 = vld [vmem:[%s3574_s14 + $0x10] sm:$0xff]  }
  0x54   : > { %2988 = vmatprep.subr.bf16.mxu1 %v3383_v2  ;;  %2990 = vmatprep.mubr.msk.bf16.mxu1 %vm3384_vm1, %v3383_v2  ;;  %v2788_v36 = vld [vmem:[%s3589_s28] ss:$0 sm:$0xff]  ;;  %v2799_v60 = vld [vmem:[%s3569_s16 + $0x1] ss:$0 sm:$0xff] }
  0x56   : > { %v3653_v6 = vld [vmem:[#allocation2] sm:$0xff]  ;;  %2981 = vmatpush3.bf16.msra.mxu0 %v3241_v4 }
  0x57   : > { %v3657_v7 = vpack.c.bf16 %v3653_v6, %v3653_v6  ;;  %2989 = vmatpush3.bf16.msra.mxu1 %v3242_v5  ;;  %2994 = vmatprep.subr.bf16.mxu0 %v3383_v2  ;;  %v2784_v9 = vld [vmem:[%s4032_s4] ss:$0 sm:$0xff]  ;;  %v2808_v61 = vld [vmem:[%s4032_s4 + $0x1] ss:$0 sm:$0xff] }
  0x58   : > { %3002 = vmatprep.subr.bf16.mxu1 %v3383_v2  ;;  %s4038_s19 = scalar_lea.vmem %s4037_s30, %s3554_s24 }
  0x59   : > { %2983 = vmatmul.mubr.msk.bf16.vlgmr.msra.gmra.mxu0 %vm870_vm2, %v3657_v7 }
  0x5a   : > { %2991 = vmatmul.mubr.msk.bf16.vlgmr.msra.gmra.mxu1 %vm870_vm2, %v3657_v7  ;;  %2998 = vmatprep.mubr.msk.bf16.mxu0 %vm3384_vm1, %v3383_v2 }
  0x5b   : > { %3004 = vmatprep.mubr.msk.bf16.mxu1 %vm3384_vm1, %v3383_v2  ;;  %2995 = vmatpush3.bf16.msra.mxu0 %v3243_v24 }
  0x5c   : > { %2996 = vmatprep.subr.bf16.mxu0 %v3383_v2 }
  0x5f   : > { %2997 = vmatpush3.bf16.msra.mxu0 %v3244_v25 }
  0x60   : > { %3008 = vmatprep.subr.bf16.mxu0 %v3383_v2 }
  0x62   : > { %2999 = vmatmul.mubr.msk.bf16.vlgmr.msra.gmra.mxu0 %vm870_vm2, %v3657_v7 }
  0x63   : > { %3010 = vmatprep.mubr.msk.bf16.mxu0 %vm3384_vm1, %v3383_v2 }
 0x119   : > { %v908_v10 = vpop.f32.mrf.mxu0 }
 0x11a   : > { %v972_v11 = vpop.f32.mrf.mxu1  ;;  %v909_v12 = vadd.f32 %v2780_v8, %v908_v10 }
 0x11b   : > { %v973_v13 = vadd.f32 %v2784_v9, %v972_v11  ;;  %v2984_v14 = vpop.f32.mrf.mxu0  ;;  %v3249_v11 = vld [vmem:[%s3584_s17 + $0x18] sm:$0xff]  }
 0x11c   : > { %v2992_v15 = vpop.f32.mrf.mxu1  ;;  %v914_v19 = vmul.f32 0.35355338, %v909_v12  ;;  %v3250_v12 = vld [vmem:[%s3584_s17 + $0x10] sm:$0xff]  }
 0x11d   : > { %v1042_v16 = vpack.c.bf16 %v973_v13, %v973_v13  ;;  %v911_v17 = vpop.f32.mrf.mxu0 }
 0x11e   : > { %v975_v18 = vpop.f32.mrf.mxu1  ;;  %v1041_v23 = vpack.c.bf16 %v914_v19, %v914_v19 }
 0x11f   : > { %v1049_v20 = vsel %vm1044_vm3, %v1042_v16, 0  ;;  %v2985_v21 = vpop.f32.mrf.mxu0  ;;  %v2817_v18 = vld [vmem:[%s3589_s28 + $0x1] ss:$0 sm:$0xff] }
 0x120   : > { %v2993_v22 = vpop.f32.mrf.mxu1  ;;  %3003 = vmatpush3.bf16.xpose.msra.mxu1 %v1049_v20 }
 0x121   : > { %3014 = vmatprep.subr.bf16.mxu1 %v3383_v2 }
 0x122   : > { %v1035_v37 = vpop.f32.mrf.mxu0 }
 0x123   : > { %v1036_v38 = vadd.f32 %v2788_v36, %v1035_v37 }
 0x124   : > { %v3000_v39 = vpop.f32.mrf.mxu0 }
 0x125   : > { %v1043_v40 = vpack.c.bf16 %v1036_v38, %v1036_v38  ;;  %v3251_v39 = vld [vmem:[%s3574_s14 + $0x28] sm:$0xff]  }
 0x126   : > { %v1038_v41 = vpop.f32.mrf.mxu0 }
 0x127   : > { %3005 = vmatmul.mubr.msk.bf16.vlgmr.msra.gmra.mxu1 %vm1044_vm3, %v1041_v23  ;;  %v1108_v42 = vsel %vm1106_vm4, %v1043_v40, 0  ;;  %v3252_v41 = vld [vmem:[%s3574_s14 + $0x20] sm:$0xff]  }
 0x128   : > { %3018 = vmatprep.mubr.msk.bf16.mxu1 %vm3384_vm1, %v3383_v2  ;;  %v3001_v43 = vpop.f32.mrf.mxu0  ;;  %3009 = vmatpush3.bf16.msra.mxu0 %v1108_v42 }
 0x129   : > { %3022 = vmatprep.subr.bf16.mxu0 %v3383_v2  ;;  %3015 = vmatpush3.bf16.msra.mxu1 %v3245_v44  ;;  %v3253_v43 = vld [vmem:[%s3563_s21 + $0x28] sm:$0xff]  }
 0x12a   : > { %3016 = vmatprep.subr.bf16.mxu1 %v3383_v2 }
 0x12d   : > { %3017 = vmatpush3.bf16.msra.mxu1 %v3247_v45 }
 0x12e   : > { %3030 = vmatprep.subr.bf16.mxu1 %v3383_v2 }
 0x130   : > { %3019 = vmatmul.mubr.msk.bf16.vlgmr.msra.gmra.mxu1 %vm870_vm2, %v3657_v7 }
 0x131   : > { %3034 = vmatprep.mubr.msk.bf16.mxu1 %vm3384_vm1, %v3383_v2  ;;  %3031 = vmatpush3.bf16.msra.mxu1 %v3249_v11 }
 0x132   : > { %3032 = vmatprep.subr.bf16.mxu1 %v3383_v2 }
 0x135   : > { %3033 = vmatpush3.bf16.msra.mxu1 %v3250_v12  ;;  %v3255_v12 = vld [vmem:[%s3584_s17 + $0x28] sm:$0xff]  }
 0x136   : > { %3044 = vmatprep.subr.bf16.mxu1 %v3383_v2 }
 0x138   : > { %3035 = vmatmul.mubr.msk.bf16.vlgmr.msra.gmra.mxu1 %vm870_vm2, %v3657_v7 }
 0x139   : > { %3046 = vmatprep.mubr.msk.bf16.mxu1 %vm3384_vm1, %v3383_v2 }
 0x1e7   : > { %v1085_v26 = vpop.f32.mrf.mxu1 }
 0x1e8   : > { %v1091_v27 = vsel %vm1044_vm3, %v1085_v26, -inf }
 0x1e9   : > { %1092 = vmax.xlane.f32.xlu0 %v1091_v27  ;;  %v3006_v28 = vpop.f32.mrf.mxu1 }
 0x1eb   : > { %v1088_v29 = vpop.f32.mrf.mxu1 }
 0x1ed   : > { %v3007_v30 = vpop.f32.mrf.mxu1 }
 0x1f0   : > { %v1211_v52 = vpop.f32.mrf.mxu1 }
 0x1f1   : > { %v1212_v63 = vadd.f32 %v2799_v60, %v1211_v52 }
 0x1f2   : > { %v3020_v53 = vpop.f32.mrf.mxu1 }
 0x1f3   : > { %v1217_v5 = vmul.f32 0.35355338, %v1212_v63  ;;  %v2840_v53 = vld [vmem:[%s4032_s4 + $0x2] ss:$0 sm:$0xff] }
 0x1f4   : > { %v1214_v54 = vpop.f32.mrf.mxu1 }
 0x1f5   : > { %v1348_v10 = vpack.c.bf16 %v1217_v5, %v1217_v5 }
 0x1f6   : > { %v3021_v55 = vpop.f32.mrf.mxu1 }
 0x1f8   : > { %v1342_v19 = vpop.f32.mrf.mxu1 }
 0x1f9   : > { %v1343_v20 = vadd.f32 %v2817_v18, %v1342_v19 }
 0x1fa   : > { %v3036_v21 = vpop.f32.mrf.mxu1 }
 0x1fb   : > { %v1350_v22 = vpack.c.bf16 %v1343_v20, %v1343_v20 }
 0x1fc   : > { %v1345_v23 = vpop.f32.mrf.mxu1 }
 0x1fd   : > { %v1413_v24 = vsel %vm1106_vm4, %v1350_v22, 0 }
 0x1fe   : > { %v3037_v25 = vpop.f32.mrf.mxu1  ;;  %3045 = vmatpush3.bf16.msra.mxu1 %v1413_v24  ;;  %v2849_v24 = vld [vmem:[%s3589_s28 + $0x2] ss:$0 sm:$0xff] }
 0x1ff   : > { %3056 = vmatprep.subr.bf16.mxu1 %v3383_v2 }
 0x272   : > { %v1093_v31 = vpop.xlane.xlu0 %1092 }
 0x273   : > { %v1094_v32 = vsub.f32 %v1085_v26, %v1093_v31  ;;  %v2823_v31 = vld [vmem:[%s4033_s12 + $0x4] sm:$0xf] }
 0x275   : > { %v1095_v33 = vmul.f32 1.442695, %v1094_v32  ;;  %v1462_v32 = vsel %vm1106_vm4, %v2823_v31, 0 }
 0x277   : > { %3269 = vpow2.f32 %v1095_v33 }
 0x284   : > { %v3270_v34 = vpop.eup %3269 }
 0x285   : > { %v1097_v35 = vsel %vm1044_vm3, %v3270_v34, 0.0 }
 0x286   : > { %1098 = vadd.xlane.f32.xlu0 %v1097_v35  ;;  %v1151_v35 = vld [vmem:[%s4033_s12] sm:$0xf] }
 0x287   : > { %v1508_v38 = vsel %vm1106_vm4, %v1151_v35, 0 }
 0x30f   : > { %v1099_v46 = vpop.xlane.xlu0 %1098 }
 0x310   : > { %3271 = vrcp.f32 %v1099_v46 }
 0x31d   : > { %v3272_v47 = vpop.eup %3271 }
 0x31e   : > { %v1101_v48 = vmul.f32 %v3272_v47, %v3270_v34  ;;  %v3254_v47 = vld [vmem:[%s3563_s21 + $0x20] sm:$0xff]  }
 0x320   : > { %v1102_v50 = vpack.c.bf16 %v1101_v48, %v1101_v48 }
 0x322   : > { %3011 = vmatmul.mubr.msk.bf16.vlgmr.msra.gmra.mxu0 %vm1044_vm3, %v1102_v50 }
 0x323   : > { %3023 = vmatpush3.bf16.msra.mxu0 %v3246_v49  ;;  %3026 = vmatprep.mubr.msk.bf16.mxu0 %vm3384_vm1, %v3383_v2 }
 0x324   : > { %3024 = vmatprep.subr.bf16.mxu0 %v3383_v2 }
 0x327   : > { %3025 = vmatpush3.bf16.msra.mxu0 %v3248_v51 }
 0x328   : > { %3038 = vmatprep.subr.bf16.mxu0 %v3383_v2 }
 0x32a   : > { %3027 = vmatmul.mubr.msk.bf16.vlgmr.msra.gmra.mxu0 %vm870_vm2, %v3657_v7 }
 0x32b   : > { %3040 = vmatprep.mubr.msk.bf16.mxu0 %vm3384_vm1, %v3383_v2 }
 0x3e2   : > { %v3708_v56 = vpop.f32.mrf.mxu0 }
 0x3e3   : > { %v1150_v40 = vpack.c.bf16 %v3708_v56, %v3708_v56 }
 0x3e4   : > { %v3012_v57 = vpop.f32.mrf.mxu0 }
 0x3e6   : > { %v1147_v58 = vpop.f32.mrf.mxu0 }
 0x3e8   : > { %v3013_v59 = vpop.f32.mrf.mxu0 }
 0x3ea   : > { %v1277_v62 = vpop.f32.mrf.mxu0 }
 0x3eb   : > { %v1278_v0 = vadd.f32 %v2808_v61, %v1277_v62 }
 0x3ec   : > { %v3028_v1 = vpop.f32.mrf.mxu0 }
 0x3ed   : > { %v1349_v3 = vpack.c.bf16 %v1278_v0, %v1278_v0  ;;  %v2831_v1 = vld [vmem:[%s3569_s16 + $0x2] ss:$0 sm:$0xff] }
 0x3ee   : > { %v1280_v4 = vpop.f32.mrf.mxu0 }
 0x3ef   : > { %v1355_v8 = vsel %vm1044_vm3, %v1349_v3, 0 }
 0x3f0   : > { %v3029_v9 = vpop.f32.mrf.mxu0  ;;  %3039 = vmatpush3.bf16.xpose.msra.mxu0 %v1355_v8 }
 0x3f1   : > { %3050 = vmatprep.subr.bf16.mxu0 %v3383_v2 }
 0x3f7   : > { %3041 = vmatmul.mubr.msk.bf16.vlgmr.msra.gmra.mxu0 %vm1044_vm3, %v1348_v10 }
 0x3f8   : > { %3052 = vmatprep.mubr.msk.bf16.mxu0 %vm3384_vm1, %v3383_v2  ;;  %3051 = vmatpush3.bf16.msra.mxu0 %v1462_v32  ;;  %v2855_v32 = vld [vmem:[%s4033_s12 + $0x8] sm:$0xf] }
 0x3f9   : > { %3062 = vmatprep.subr.bf16.mxu0 %v3383_v2 }
 0x4b7   : > { %v1391_v13 = vpop.f32.mrf.mxu0 }
 0x4b8   : > { %v1397_v14 = vsel %vm1044_vm3, %v1391_v13, -inf }
 0x4b9   : > { %1398 = vmax.xlane.f32.xlu1 %v1397_v14  ;;  %v3042_v15 = vpop.f32.mrf.mxu0 }
 0x4bb   : > { %v1394_v16 = vpop.f32.mrf.mxu0 }
 0x4bd   : > { %v3043_v17 = vpop.f32.mrf.mxu0 }
 0x542   : > { %v1399_v26 = vpop.xlane.xlu1 %1398 }
 0x543   : > { %v1400_v27 = vsub.f32 %v1391_v13, %v1399_v26  ;;  %v3256_v13 = vld [vmem:[%s3584_s17 + $0x20] sm:$0xff]  }
 0x545   : > { %v1401_v28 = vmul.f32 1.442695, %v1400_v27 }
 0x547   : > { %3273 = vpow2.f32 %v1401_v28 }
 0x554   : > { %v3274_v29 = vpop.eup %3273 }
 0x555   : > { %v1403_v30 = vsel %vm1044_vm3, %v3274_v29, 0.0 }
 0x556   : > { %1404 = vadd.xlane.f32.xlu1 %v1403_v30 }
 0x5df   : > { %v1405_v33 = vpop.xlane.xlu1 %1404 }
 0x5e0   : > { %3275 = vrcp.f32 %v1405_v33  ;;  %v1860_v33 = vsel %vm1106_vm4, %v2855_v32, 0 }
 0x5ed   : > { %v3276_v34 = vpop.eup %3275 }
 0x5ee   : > { %v1407_v36 = vmul.f32 %v3276_v34, %v3274_v29 }
 0x5f0   : > { %v1408_v37 = vpack.c.bf16 %v1407_v36, %v1407_v36 }
 0x5f2   : > { %3047 = vmatmul.mubr.msk.bf16.vlgmr.msra.gmra.mxu1 %vm1044_vm3, %v1408_v37 }
 0x5f3   : > { %3057 = vmatpush3.bf16.msra.mxu1 %v1508_v38  ;;  %3058 = vmatprep.mubr.msk.bf16.mxu1 %vm3384_vm1, %v3383_v2  ;;  %v3258_v38 = vld [vmem:[%s3563_s21 + $0x38] sm:$0xff]  }
 0x5f4   : > { %3070 = vmatprep.subr.bf16.mxu1 %v3383_v2 }
 0x5fa   : > { %3059 = vmatmul.mubr.msk.bf16.vlgmr.msra.gmra.mxu1 %vm1044_vm3, %v1150_v40 }
 0x5fb   : > { %3071 = vmatpush3.bf16.msra.mxu1 %v3251_v39  ;;  %3074 = vmatprep.mubr.msk.bf16.mxu1 %vm3384_vm1, %v3383_v2  ;;  %v3260_v39 = vld [vmem:[%s3563_s21 + $0x30] sm:$0xff]  }
 0x5fc   : > { %3072 = vmatprep.subr.bf16.mxu1 %v3383_v2 }
 0x5ff   : > { %3073 = vmatpush3.bf16.msra.mxu1 %v3252_v41  ;;  %v3257_v41 = vld [vmem:[%s3574_s14 + $0x38] sm:$0xff]  }
 0x600   : > { %3086 = vmatprep.subr.bf16.mxu1 %v3383_v2 }
 0x602   : > { %3075 = vmatmul.mubr.msk.bf16.vlgmr.msra.gmra.mxu1 %vm870_vm2, %v3657_v7 }
 0x603   : > { %3088 = vmatprep.mubr.msk.bf16.mxu1 %vm3384_vm1, %v3383_v2 }
 0x6b2   : > { %v1449_v42 = vpop.f32.mrf.mxu1 }
 0x6b3   : > { %v1455_v44 = vpack.c.bf16 %v1449_v42, %v1449_v42 }
 0x6b4   : > { %v3048_v45 = vpop.f32.mrf.mxu1 }
 0x6b5   : > { %3053 = vmatmul.mubr.msk.bf16.vlgmr.msra.gmra.mxu0 %vm1044_vm3, %v1455_v44  ;;  %v3259_v45 = vld [vmem:[%s3574_s14 + $0x30] sm:$0xff]  }
 0x6b6   : > { %v1452_v46 = vpop.f32.mrf.mxu1  ;;  %3063 = vmatpush3.bf16.msra.mxu0 %v3253_v43  ;;  %3066 = vmatprep.mubr.msk.bf16.mxu0 %vm3384_vm1, %v3383_v2 }
 0x6b7   : > { %3064 = vmatprep.subr.bf16.mxu0 %v3383_v2 }
 0x6b8   : > { %v3049_v48 = vpop.f32.mrf.mxu1 }
 0x6ba   : > { %v3758_v49 = vpop.f32.mrf.mxu1  ;;  %3065 = vmatpush3.bf16.msra.mxu0 %v3254_v47 }
 0x6bb   : > { %3078 = vmatprep.subr.bf16.mxu0 %v3383_v2 }
 0x6bc   : > { %v3060_v50 = vpop.f32.mrf.mxu1 }
 0x6bd   : > { %3067 = vmatmul.mubr.msk.bf16.vlgmr.msra.gmra.mxu0 %vm870_vm2, %v3657_v7 }
 0x6be   : > { %v1547_v51 = vpop.f32.mrf.mxu1  ;;  %3082 = vmatprep.mubr.msk.bf16.mxu0 %vm3384_vm1, %v3383_v2  ;;  %3079 = vmatpush3.bf16.msra.mxu0 %v3255_v12 }
 0x6bf   : > { %3080 = vmatprep.subr.bf16.mxu0 %v3383_v2 }
 0x6c0   : > { %v3061_v52 = vpop.f32.mrf.mxu1 }
 0x6c2   : > { %v1675_v54 = vpop.f32.mrf.mxu1  ;;  %3081 = vmatpush3.bf16.msra.mxu0 %v3256_v13 }
 0x6c3   : > { %v1676_v55 = vadd.f32 %v2840_v53, %v1675_v54  ;;  %3092 = vmatprep.subr.bf16.mxu0 %v3383_v2 }
 0x6c4   : > { %v3076_v56 = vpop.f32.mrf.mxu1 }
 0x6c5   : > { %v1747_v57 = vpack.c.bf16 %v1676_v55, %v1676_v55  ;;  %3083 = vmatmul.mubr.msk.bf16.vlgmr.msra.gmra.mxu0 %vm870_vm2, %v3657_v7 }
 0x6c6   : > { %v1678_v58 = vpop.f32.mrf.mxu1  ;;  %3094 = vmatprep.mubr.msk.bf16.mxu0 %vm3384_vm1, %v3383_v2 }
 0x6c7   : > { %v1753_v59 = vsel %vm1044_vm3, %v1747_v57, 0  ;;  %v2871_v58 = vld [vmem:[%s4032_s4 + $0x3] ss:$0 sm:$0xff]  ;;  %s4041_s4 = sld [smem:[#allocation9_spill]] }
 0x6c8   : > { %v3077_v60 = vpop.f32.mrf.mxu1  ;;  %3087 = vmatpush3.bf16.xpose.msra.mxu1 %v1753_v59  ;;  %v2862_v59 = vld [vmem:[%s3569_s16 + $0x3] ss:$0 sm:$0xff] }
 0x6c9   : > { %3098 = vmatprep.subr.bf16.mxu1 %v3383_v2 }
 0x6cd   : > { %p2899_p1 = scmp.ne.s32.totalorder %s4041_s4, 1 }
 0x775   : > { %v3768_v61 = vpop.f32.mrf.mxu0 }
 0x776   : > { %v1545_v52 = vadd.f32 %v3758_v49, %v3768_v61 }
 0x777   : > { %v3054_v62 = vpop.f32.mrf.mxu0 }
 0x779   : > { %v1501_v63 = vpop.f32.mrf.mxu0 }
 0x77b   : > { %v3055_v0 = vpop.f32.mrf.mxu0 }
 0x77d   : > { %v1609_v3 = vpop.f32.mrf.mxu0 }
 0x77e   : > { %v1610_v4 = vadd.f32 %v2831_v1, %v1609_v3 }
 0x77f   : > { %v3068_v5 = vpop.f32.mrf.mxu0 }
 0x780   : > { %v1615_v8 = vmul.f32 0.35355338, %v1610_v4 }
 0x781   : > { %v1612_v9 = vpop.f32.mrf.mxu0 }
 0x782   : > { %v1746_v10 = vpack.c.bf16 %v1615_v8, %v1615_v8  ;;  %v3261_v8 = vld [vmem:[%s3584_s17 + $0x38] sm:$0xff]   ;;  %v3262_v9 = vld [vmem:[%s3584_s17 + $0x30] sm:$0xff]  }
 0x783   : > { %v3069_v11 = vpop.f32.mrf.mxu0 }
 0x784   : > { %3089 = vmatmul.mubr.msk.bf16.vlgmr.msra.gmra.mxu1 %vm1044_vm3, %v1746_v10 }
 0x785   : > { %3100 = vmatprep.mubr.msk.bf16.mxu1 %vm3384_vm1, %v3383_v2  ;;  %v1740_v25 = vpop.f32.mrf.mxu0  ;;  %3099 = vmatpush3.bf16.msra.mxu1 %v1860_v33 }
 0x786   : > { %v1741_v26 = vadd.f32 %v2849_v24, %v1740_v25  ;;  %3112 = vmatprep.subr.bf16.mxu1 %v3383_v2 }
 0x787   : > { %v3084_v27 = vpop.f32.mrf.mxu0 }
 0x788   : > { %v1748_v28 = vpack.c.bf16 %v1741_v26, %v1741_v26  ;;  %v2886_v27 = vld [vmem:[%s4033_s12 + $0xc] sm:$0xf] }
 0x789   : > { %v1743_v29 = vpop.f32.mrf.mxu0 }
 0x78a   : > { %v1811_v30 = vsel %vm1106_vm4, %v1748_v28, 0  ;;  %v2213_v28 = vsel %vm1106_vm4, %v2886_v27, 0 }
 0x78b   : > { %v3085_v31 = vpop.f32.mrf.mxu0  ;;  %3093 = vmatpush3.bf16.msra.mxu0 %v1811_v30 }
 0x78c   : > { %3104 = vmatprep.subr.bf16.mxu0 %v3383_v2 }
 0x844   : > { %v1789_v14 = vpop.f32.mrf.mxu1 }
 0x845   : > { %v1795_v15 = vsel %vm1044_vm3, %v1789_v14, -inf }
 0x846   : > { %1796 = vmax.xlane.f32.xlu0 %v1795_v15  ;;  %v3090_v16 = vpop.f32.mrf.mxu1 }
 0x848   : > { %v1792_v17 = vpop.f32.mrf.mxu1 }
 0x84a   : > { %v3091_v18 = vpop.f32.mrf.mxu1 }
 0x8cf   : > { %v1797_v19 = vpop.xlane.xlu0 %1796 }
 0x8d0   : > { %v1798_v20 = vsub.f32 %v1789_v14, %v1797_v19 }
 0x8d2   : > { %v1799_v21 = vmul.f32 1.442695, %v1798_v20 }
 0x8d4   : > { %3277 = vpow2.f32 %v1799_v21 }
 0x8e1   : > { %v3278_v22 = vpop.eup %3277 }
 0x8e2   : > { %v1801_v23 = vsel %vm1044_vm3, %v3278_v22, 0.0 }
 0x8e3   : > { %1802 = vadd.xlane.f32.xlu1 %v1801_v23 }
 0x96c   : > { %v1803_v34 = vpop.xlane.xlu1 %1802 }
 0x96d   : > { %3279 = vrcp.f32 %v1803_v34 }
 0x97a   : > { %v3280_v35 = vpop.eup %3279 }
 0x97b   : > { %v1805_v36 = vmul.f32 %v3280_v35, %v3278_v22 }
 0x97d   : > { %v1806_v37 = vpack.c.bf16 %v1805_v36, %v1805_v36 }
 0x97f   : > { %3095 = vmatmul.mubr.msk.bf16.vlgmr.msra.gmra.mxu0 %vm1044_vm3, %v1806_v37 }
 0x980   : > { %3108 = vmatprep.mubr.msk.bf16.mxu0 %vm3384_vm1, %v3383_v2  ;;  %3105 = vmatpush3.bf16.msra.mxu0 %v3258_v38 }
 0x981   : > { %3106 = vmatprep.subr.bf16.mxu0 %v3383_v2 }
 0x984   : > { %3107 = vmatpush3.bf16.msra.mxu0 %v3260_v39  ;;  %v2888_v39 = vld [vmem:[%s4034_s1] ss:$0 sm:$0xff] }
 0x985   : > { %3120 = vmatprep.subr.bf16.mxu0 %v3383_v2 }
 0x987   : > { %3109 = vmatmul.mubr.msk.bf16.vlgmr.msra.gmra.mxu0 %vm870_vm2, %v3657_v7 }
 0x988   : > { %3124 = vmatprep.mubr.msk.bf16.mxu0 %vm3384_vm1, %v3383_v2  ;;  %3121 = vmatpush3.bf16.msra.mxu0 %v3261_v8 }
 0x989   : > { %3122 = vmatprep.subr.bf16.mxu0 %v3383_v2 }
 0x98c   : > { %3123 = vmatpush3.bf16.msra.mxu0 %v3262_v9 }
 0x98d   : > { %3134 = vmatprep.subr.bf16.mxu0 %v3383_v2 }
 0x98f   : > { %3125 = vmatmul.mubr.msk.bf16.vlgmr.msra.gmra.mxu0 %vm870_vm2, %v3657_v7 }
 0x990   : > { %3136 = vmatprep.mubr.msk.bf16.mxu0 %vm3384_vm1, %v3383_v2 }
 0xa3f   : > { %v1847_v40 = vpop.f32.mrf.mxu0 }
 0xa40   : > { %v1853_v42 = vpack.c.bf16 %v1847_v40, %v1847_v40 }
 0xa41   : > { %v3096_v43 = vpop.f32.mrf.mxu0 }
 0xa42   : > { %3101 = vmatmul.mubr.msk.bf16.vlgmr.msra.gmra.mxu1 %vm1044_vm3, %v1853_v42 }
 0xa43   : > { %v1850_v44 = vpop.f32.mrf.mxu0  ;;  %3113 = vmatpush3.bf16.msra.mxu1 %v3257_v41  ;;  %3116 = vmatprep.mubr.msk.bf16.mxu1 %vm3384_vm1, %v3383_v2 }
 0xa44   : > { %3114 = vmatprep.subr.bf16.mxu1 %v3383_v2 }
 0xa45   : > { %v3097_v46 = vpop.f32.mrf.mxu0 }
 0xa47   : > { %3115 = vmatpush3.bf16.msra.mxu1 %v3259_v45  ;;  %v1962_v47 = vpop.f32.mrf.mxu0 }
 0xa48   : > { %3128 = vmatprep.subr.bf16.mxu1 %v3383_v2  ;;  %v1963_v63 = vadd.f32 %v2862_v59, %v1962_v47 }
 0xa49   : > { %v3110_v48 = vpop.f32.mrf.mxu0 }
 0xa4a   : > { %3117 = vmatmul.mubr.msk.bf16.vlgmr.msra.gmra.mxu1 %vm870_vm2, %v3657_v7  ;;  %v1968_v5 = vmul.f32 0.35355338, %v1963_v63  ;;  %v2880_v7 = vld [vmem:[%s3589_s28 + $0x3] ss:$0 sm:$0xff] }
 0xa4b   : > { %3130 = vmatprep.mubr.msk.bf16.mxu1 %vm3384_vm1, %v3383_v2  ;;  %v1965_v50 = vpop.f32.mrf.mxu0 }
 0xa4c   : > { %v2099_v61 = vpack.c.bf16 %v1968_v5, %v1968_v5  ;;  %v3263_v50 = vld [vmem:[%s3604_s26 + $0x8] sm:$0xff]  }
 0xa4d   : > { %v3111_v51 = vpop.f32.mrf.mxu0 }
 0xa4e   : > { %v3264_v51 = vld [vmem:[%s3604_s26] sm:$0xff]  }
 0xa4f   : > { %v2093_v20 = vpop.f32.mrf.mxu0 }
 0xa50   : > { %v2094_v21 = vadd.f32 %v2880_v7, %v2093_v20  ;;  %v2889_v7 = vld [vmem:[%s4036_s2] ss:$0 sm:$0xff] }
 0xa51   : > { %v3126_v22 = vpop.f32.mrf.mxu0 }
 0xa52   : > { %v2101_v23 = vpack.c.bf16 %v2094_v21, %v2094_v21 }
 0xa53   : > { %v2096_v24 = vpop.f32.mrf.mxu0 }
 0xa54   : > { %v2164_v25 = vsel %vm1106_vm4, %v2101_v23, 0 }
 0xa55   : > { %v3127_v26 = vpop.f32.mrf.mxu0  ;;  %3135 = vmatpush3.bf16.msra.mxu0 %v2164_v25 }
 0xa56   : > { %3146 = vmatprep.subr.bf16.mxu0 %v3383_v2 }
 0xb02   : > { %v1896_v53 = vpop.f32.mrf.mxu1 }
 0xb03   : > { %v3814_v54 = vadd.f32 %v1896_v53, %v1545_v52  ;;  %v3265_v52 = vld [vmem:[%s3618_s3 + $0x18] sm:$0xff]   ;;  %v3266_v53 = vld [vmem:[%s3618_s3 + $0x10] sm:$0xff]  }
 0xb04   : > { %v3102_v55 = vpop.f32.mrf.mxu1 }
 0xb06   : > { %v1899_v56 = vpop.f32.mrf.mxu1 }
 0xb08   : > { %v3103_v57 = vpop.f32.mrf.mxu1 }
 0xb0a   : > { %v2028_v60 = vpop.f32.mrf.mxu1 }
 0xb0b   : > { %v2029_v62 = vadd.f32 %v2871_v58, %v2028_v60 }
 0xb0c   : > { %v3118_v0 = vpop.f32.mrf.mxu1 }
 0xb0d   : > { %v2100_v1 = vpack.c.bf16 %v2029_v62, %v2029_v62 }
 0xb0e   : > { %v2031_v3 = vpop.f32.mrf.mxu1 }
 0xb0f   : > { %v2106_v4 = vsel %vm1044_vm3, %v2100_v1, 0 }
 0xb10   : > { %v3119_v49 = vpop.f32.mrf.mxu1  ;;  %3129 = vmatpush3.bf16.xpose.msra.mxu1 %v2106_v4 }
 0xb11   : > { %3140 = vmatprep.subr.bf16.mxu1 %v3383_v2 }
 0xb17   : > { %3131 = vmatmul.mubr.msk.bf16.vlgmr.msra.gmra.mxu1 %vm1044_vm3, %v2099_v61 }
 0xb18   : > { %3142 = vmatprep.mubr.msk.bf16.mxu1 %vm3384_vm1, %v3383_v2  ;;  %3141 = vmatpush3.bf16.msra.mxu1 %v2213_v28 }
 0xb19   : > { %3154 = vmatprep.subr.bf16.mxu1 %v3383_v2 }
 0xbd7   : > { %v2142_v10 = vpop.f32.mrf.mxu1 }
 0xbd8   : > { %v2148_v11 = vsel %vm1044_vm3, %v2142_v10, -inf }
 0xbd9   : > { %2149 = vmax.xlane.f32.xlu0 %v2148_v11  ;;  %v3132_v12 = vpop.f32.mrf.mxu1 }
 0xbda   : > { %v2265_v12 = vld [vmem:[%s824_s5] sm:$0xff] }
 0xbdb   : > { %v2145_v13 = vpop.f32.mrf.mxu1 }
 0xbdd   : > { %v3133_v14 = vpop.f32.mrf.mxu1 }
 0xbde   : > { %v2266_v14 = vld [vmem:[%s828_s6] sm:$0xff] }
 0xc62   : > { %v2150_v15 = vpop.xlane.xlu0 %2149 }
 0xc63   : > { %v2151_v16 = vsub.f32 %v2142_v10, %v2150_v15 }
 0xc65   : > { %v2152_v17 = vmul.f32 1.442695, %v2151_v16 }
 0xc67   : > { %3281 = vpow2.f32 %v2152_v17 }
 0xc74   : > { %v3282_v18 = vpop.eup %3281 }
 0xc75   : > { %v2154_v19 = vsel %vm1044_vm3, %v3282_v18, 0.0 }
 0xc76   : > { %2155 = vadd.xlane.f32.xlu1 %v2154_v19  ;;  %v3268_v19 = vld [vmem:[%s3618_s3] sm:$0xff]  }
 0xcff   : > { %v2156_v29 = vpop.xlane.xlu1 %2155 }
 0xd00   : > { %3283 = vrcp.f32 %v2156_v29 }
 0xd0d   : > { %v3284_v30 = vpop.eup %3283 }
 0xd0e   : > { %v2158_v31 = vmul.f32 %v3284_v30, %v3282_v18  ;;  %v3267_v18 = vld [vmem:[%s3618_s3 + $0x8] sm:$0xff]  }
 0xd10   : > { %v2159_v32 = vpack.c.bf16 %v2158_v31, %v2158_v31 }
 0xd12   : > { %3137 = vmatmul.mubr.msk.bf16.vlgmr.msra.gmra.mxu0 %vm1044_vm3, %v2159_v32 }
 0xd13   : > { %3150 = vmatprep.mubr.msk.bf16.mxu0 %vm3384_vm1, %v3383_v2  ;;  %3147 = vmatpush3.bf16.msra.mxu0 %v3263_v50 }
 0xd14   : > { %3148 = vmatprep.subr.bf16.mxu0 %v3383_v2 }
 0xd17   : > { %3149 = vmatpush3.bf16.msra.mxu0 %v3264_v51 }
 0xdd2   : > { %v2200_v33 = vpop.f32.mrf.mxu0 }
 0xdd3   : > { %v2206_v34 = vpack.c.bf16 %v2200_v33, %v2200_v33 }
 0xdd4   : > { %v3138_v35 = vpop.f32.mrf.mxu0 }
 0xdd5   : > { %3143 = vmatmul.mubr.msk.bf16.vlgmr.msra.gmra.mxu1 %vm1044_vm3, %v2206_v34 }
 0xdd6   : > { %v2203_v36 = vpop.f32.mrf.mxu0  ;;  %3162 = vmatprep.mubr.msk.bf16.mxu1 %vm3384_vm1, %v3383_v2  ;;  %3155 = vmatpush3.bf16.msra.mxu1 %v3265_v52 }
 0xdd7   : > { %3156 = vmatprep.subr.bf16.mxu1 %v3383_v2 }
 0xdd8   : > { %v3139_v37 = vpop.f32.mrf.mxu0 }
 0xdda   : > { %3157 = vmatpush3.bf16.msra.mxu1 %v3266_v53 }
 0xddb   : > { %3158 = vmatprep.subr.bf16.mxu1 %v3383_v2 }
 0xdde   : > { %3159 = vmatpush3.bf16.msra.mxu1 %v3267_v18 }
 0xddf   : > { %3160 = vmatprep.subr.bf16.mxu1 %v3383_v2  ;;  %v2893_v2 = vld [vmem:[%s4038_s19] ss:$0 sm:$0xff] }
 0xde2   : > { %3161 = vmatpush3.bf16.msra.mxu1 %v3268_v19 }
 0xe95   : > { %v2249_v38 = vpop.f32.mrf.mxu1 }
 0xe96   : > { %v2255_v40 = vadd.f32 %v2249_v38, %v3814_v54 }
 0xe97   : > { %v3144_v41 = vpop.f32.mrf.mxu1 }
 0xe98   : > { %v2263_v42 = vadd.f32 %v2888_v39, %v2255_v40 }
 0xe99   : > { %v2252_v43 = vpop.f32.mrf.mxu1 }
 0xe9a   : > { %v2264_v44 = vadd.f32 %v2263_v42, %v3653_v6 }
 0xe9b   : > { %v3145_v45 = vpop.f32.mrf.mxu1 }
 0xe9c   : > { %v2267_v46 = vsel %vm870_vm2, %v2264_v44, 0.0  ;;  %v2276_v47 = vmul.f32 %v2264_v44, %v2264_v44 }
 0xe9d   : > { %2268 = vadd.xlane.f32.xlu0 %v2267_v46 }
 0xe9e   : > { %v2277_v48 = vsel %vm870_vm2, %v2276_v47, 0.0 }
 0xe9f   : > { %2278 = vadd.xlane.f32.xlu1 %v2277_v48 }
 0xf26   : > { %v2269_v6 = vpop.xlane.xlu0 %2268 }
 0xf27   : > { %v2270_v54 = vrot.slane %v2269_v6, 4 }
 0xf28   : > { %v2279_v55 = vpop.xlane.xlu1 %2278 }
 0xf29   : > { %v2271_v56 = vadd.f32 %v2270_v54, %v2269_v6  ;;  %v2280_v57 = vrot.slane %v2279_v55, 4 }
 0xf2b   : > { %v2272_v58 = vrot.slane %v2271_v56, 2  ;;  %v2281_v59 = vadd.f32 %v2280_v57, %v2279_v55  ;;  %v2449_v57 = vld [vmem:[%s832_s7] sm:$0xff] }
 0xf2d   : > { %v2273_v60 = vadd.f32 %v2272_v58, %v2271_v56  ;;  %v2282_v62 = vrot.slane %v2281_v59, 2 }
 0xf2f   : > { %v2274_v63 = vrot.slane %v2273_v60, 1  ;;  %v2283_v0 = vadd.f32 %v2282_v62, %v2281_v59  ;;  %v2450_v59 = vld [vmem:[%s836_s9] sm:$0xff] }
 0xf31   : > { %v2275_v1 = vadd.f32 %v2274_v63, %v2273_v60  ;;  %v2284_v3 = vrot.slane %v2283_v0, 1 }
 0xf33   : > { %v2286_v4 = vmul.f32 0.00390625, %v2275_v1  ;;  %v2285_v5 = vadd.f32 %v2284_v3, %v2283_v0 }
 0xf35   : > { %v2288_v49 = vmul.f32 %v2286_v4, %v2286_v4  ;;  %v2287_v61 = vmul.f32 0.00390625, %v2285_v5  ;;  %v2290_v10 = vsub.f32 %v2264_v44, %v2286_v4 }
 0xf37   : > { %v2289_v8 = vsub.f32 %v2287_v61, %v2288_v49 }
 0xf39   : > { %v2291_v9 = vadd.f32 1e-06, %v2289_v8 }
 0xf3b   : > { %3285 = vrsqrt.f32 %v2291_v9 }
 0xf48   : > { %v3286_v11 = vpop.eup %3285 }
 0xf49   : > { %v2293_v13 = vmul.f32 %v3286_v11, %v2290_v10 }
 0xf4b   : > { %v2294_v15 = vmul.f32 %v2293_v13, %v2265_v12 }
 0xf4d   : > { %v2295_v16 = vadd.f32 %v2294_v15, %v2266_v14 }
 0xf4f   : > { %v2296_v17 = vpack.c.bf16 %v2295_v16, %v2295_v16 }
 0xf51   : > { %3151 = vmatmul.mubr.msk.bf16.vlgmr.msra.gmra.mxu0 %vm870_vm2, %v2296_v17 }
0x1011   : > { %v2357_v20 = vpop.f32.mrf.mxu0 }
0x1012   : > { %v2358_v21 = vadd.f32 %v2889_v7, %v2357_v20 }
0x1013   : > { %v3152_v22 = vpop.f32.mrf.mxu0 }
0x1014   : > { %v2363_v23 = vmax.f32 %v2358_v21, 0.0 }
0x1015   : > { %v2360_v24 = vpop.f32.mrf.mxu0 }
0x1016   : > { %v2364_v25 = vpack.c.bf16 %v2363_v23, %v2363_v23 }
0x1017   : > { %v3153_v26 = vpop.f32.mrf.mxu0 }
0x1018   : > { %3163 = vmatmul.mubr.msk.bf16.vlgmr.msra.gmra.mxu1 %vm2404_vm5, %v2364_v25 }
0x10d8   : > { %v2442_v27 = vpop.f32.mrf.mxu1 }
0x10d9   : > { %v2443_v28 = vadd.f32 %v2893_v2, %v2442_v27 }
0x10da   : > { %v3164_v29 = vpop.f32.mrf.mxu1 }
0x10db   : > { %v2448_v30 = vadd.f32 %v2443_v28, %v2295_v16 }
0x10dc   : > { %v2445_v31 = vpop.f32.mrf.mxu1 }
0x10dd   : > { %v2451_v32 = vsel %vm870_vm2, %v2448_v30, 0.0  ;;  %v2460_v33 = vmul.f32 %v2448_v30, %v2448_v30 }
0x10de   : > { %2452 = vadd.xlane.f32.xlu0 %v2451_v32  ;;  %v3165_v34 = vpop.f32.mrf.mxu1 }
0x10df   : > { %v2461_v35 = vsel %vm870_vm2, %v2460_v33, 0.0 }
0x10e0   : > { %2462 = vadd.xlane.f32.xlu1 %v2461_v35 }
0x1167   : > { %v2453_v36 = vpop.xlane.xlu0 %2452 }
0x1168   : > { %v2454_v37 = vrot.slane %v2453_v36, 4 }
0x1169   : > { %v2463_v38 = vpop.xlane.xlu1 %2462 }
0x116a   : > { %v2455_v39 = vadd.f32 %v2454_v37, %v2453_v36  ;;  %v2464_v40 = vrot.slane %v2463_v38, 4 }
0x116c   : > { %v2456_v41 = vrot.slane %v2455_v39, 2  ;;  %v2465_v42 = vadd.f32 %v2464_v40, %v2463_v38 }
0x116e   : > { %v2457_v43 = vadd.f32 %v2456_v41, %v2455_v39  ;;  %v2466_v44 = vrot.slane %v2465_v42, 2 }
0x1170   : > { %v2458_v45 = vrot.slane %v2457_v43, 1  ;;  %v2467_v46 = vadd.f32 %v2466_v44, %v2465_v42 }
0x1172   : > { %v2459_v47 = vadd.f32 %v2458_v45, %v2457_v43  ;;  %v2468_v48 = vrot.slane %v2467_v46, 1 }
0x1174   : > { %v2470_v50 = vmul.f32 0.00390625, %v2459_v47  ;;  %v2469_v51 = vadd.f32 %v2468_v48, %v2467_v46 }
0x1176   : > { %v2472_v52 = vmul.f32 %v2470_v50, %v2470_v50  ;;  %v2471_v53 = vmul.f32 0.00390625, %v2469_v51  ;;  %v2474_v55 = vsub.f32 %v2448_v30, %v2470_v50 }
0x1178   : > { %v2473_v6 = vsub.f32 %v2471_v53, %v2472_v52 }
0x117a   : > { %v2475_v54 = vadd.f32 1e-06, %v2473_v6 }
0x117c   : > { %3287 = vrsqrt.f32 %v2475_v54 }
0x1189   : > { %v3288_v56 = vpop.eup %3287 }
0x118a   : > { %v2477_v58 = vmul.f32 %v3288_v56, %v2474_v55 }
0x118c   : > { %v2478_v60 = vmul.f32 %v2477_v58, %v2449_v57  ;;  %2484 = sbr.rel (%p2899_p1) target bundleno = 4498 (0x1192), region = 96 }
0x118e   : > { %v2479_v62 = vadd.f32 %v2478_v60, %v2450_v59 }
0x1190   : > { %2480 = vst.msk [vmem:[#allocation2] sm:$0xff] %vm870_vm2, %v2479_v62 }
0x1191   : > { %2485 = vst.msk [vmem:[%s765_s11] sm:$0xff] %vm870_vm2, %v2479_v62 }
0x1192 PF: > { %s4042_s12 = sld [smem:[#allocation10_spill]]  ;;  %s2500_s17 = sshll.u32 %s765_s11, 4  ;;  %s2501_s17 = int_to_ptr.vmem [resolvable:$true] %s2500_s17 }
0x1193   : > { %s4043_s7 = sld [smem:[#allocation7_spill]]  ;;  %s3289_s25 = scalar_lea.vmem %s2501_s17, 128 }
0x1194   : > { %s4045_s9 = sld [smem:[#allocation35_spill]]  ;;  %p3290_p2 = scmp.ne.s32.totalorder %s2501_s17, %s3289_s25 }
0x1195   : > { %s3385_s15 = smov [#allocation3]  }
0x1196   : > { %p3291_p4 = pnand %p3290_p2, %p3525_p3  ;;  %s3293_s23 = sshll.u32 %s3385_s15, 4  ;;  %s3294_s23 = int_to_ptr.vmem [resolvable:$false] %s3293_s23 }
0x1197   : > { %s3295_s2 = scalar_lea.vmem %s3294_s23, 256  ;;  %p3296_p6 = scmp.lt.s32.totalorder %s2501_s17, %s3294_s23 }
0x1198   : > { %s2901_s16 = sshll.u32 %s4042_s12, 7  ;;  %p3292_p5 = pneg %p3291_p4 }
0x1199   : > { %s4046_s28 = sand.u32 1, %s4043_s7   ;;  %p3297_p7 = scmp.lt.s32.totalorder %s3295_s2, %s3289_s25 }
0x119a   : > { %s2498_s21 = scalar_lea.hbm %s4045_s9, %s2901_s16  ;;  %s2487_s26 = scalar_lea.sflag [#allocation4], %s4046_s28 }
0x119b   : > { %p3298_p8 = por %p3297_p7, %p3296_p6 }
0x119d   : > { %p3299_p10 = pnand %p3298_p8, %p3292_p5 }
0x119f   : > { %3302 = shalt.err (!%p3299_p10)
}
0x11a0   : > { %s3303_s5 = scalar_lea.hbm %s2498_s21, 128  ;;  %s3307_s0 = scalar_lea.hbm %s4045_s9, 256 }
0x11a1   : > { %p3304_p11 = scmp.ne.s32.totalorder %s2498_s21, %s3303_s5  ;;  %p3308_p0 = scmp.lt.s32.totalorder %s2498_s21, %s4045_s9 }
0x11a2   : > { %p3309_p1 = scmp.lt.s32.totalorder %s3307_s0, %s3303_s5 }
0x11a3   : > { %p3305_p12 = pnand %p3304_p11, %p3525_p3 }
0x11a4   : > { %p3310_p2 = por %p3309_p1, %p3308_p0 }
0x11a5   : > { %p3306_p13 = pneg %p3305_p12 }
0x11a7   : > { %p3311_p4 = pnand %p3310_p2, %p3306_p13 }
0x11a9   : > { %3314 = shalt.err (!%p3311_p4)
}
0x11aa   : > { %3166 = dma.vmem_to_hbm [thread:$0]  (%p3525_p3), %s2501_s17, 128, %s2498_s21, %s2487_s26  }
0x11ab PF: > { %s4047_s3 = sld [smem:[#allocation13_spill]] }
0x11ac   : > { %s4048_s24 = sld [smem:[#allocation6_spill]] }
0x11b1   : > { %p3172_p5 = scmp.ge.s32.totalorder %s4047_s3, 2 }
0x11b2   : > { %s2512_s27 = sand.u32 1, %s4048_s24  }
0x11b3   : > { %p3169_p6 = pnand %p3172_p5, %p3535_p9  ;;  %s2513_s18 = scalar_lea.sflag [#allocation4], %s2512_s27 }
0x11b5   : > { %p3170_p7 = pneg %p3169_p6 }
0x11b7   : > { %3348 = dma.done.wait (%p3170_p7), %s2513_s18, 128  }
0x11b8   : > { %3350 = vsyncadd (%p3170_p7), %s2513_s18, 4294967168  ;;  %s30_s30 = sadd.s32 1, %s4047_s3   ;;  %s4050_s24 = sld [smem:[#allocation7_spill]] }
0x11b9   : > { %p27_p8 = scmp.ge.s32.totalorder %s30_s30, 6   ;;  %s4051_s25 = sld [smem:[#allocation8_spill]] }
0x11ba   : > { %s4052_s26 = sld [smem:[#allocation18_spill]] }
0x11bb   : > { %s4053_s27 = sld [smem:[#allocation11_spill]]  ;;  %29 = sbr.rel (!%p27_p8) target bundleno = 21 (0x15), region = 200 }
0x11bc   : > { %s4054_s28 = sld [smem:[#allocation12_spill]] }
0x11bd   : > { %s4055_s29 = sld [smem:[#allocation14_spill]] }
0x11be   : > { %s4056_s0 = sld [smem:[#allocation16_spill]] }
0x11c0   :  { %2518 = vsyncpa [#allocation4], 1 }
0x11c1   :  { %2520 = vsyncpa [#allocation4 + $0x1], 1 }

</bundles_post_ra>
